<compile_context>
chip_gen: v7x
topology: tpu7x:2x2x1
jax: 0.10.0
libtpu: 0.0.40
codegen_flags: <defaults>
</compile_context>

<pallas_src>
import jax
import jax.numpy as jnp
from jax import lax
from jax.experimental import pallas as pl
from jax.experimental.pallas import tpu as pltpu

# vocab derived from an in-script text, mirroring the module's setup
text = "long lstm pallas tpu kernel"
chars = sorted(list(set(text)))
itos = {i: ch for i, ch in enumerate(chars)}
vocab_size = len(itos)

D_MODEL = 24
N_HIDDEN = 128   # module uses 1000; demo uses a lane-aligned small size
SUBLANE = 8


def _sigmoid(x):
    # sigmoid(x) == 0.5 * tanh(0.5 * x) + 0.5 : single EUP op per slab.
    return 0.5 * jnp.tanh(0.5 * x) + 0.5


def _lstm_recurrence_kernel(gx_ref, Wt_ref, h0_ref, c0_ref, h_out_ref):
    """Serial LSTM recurrence only; everything resident in VMEM (grid=()).

    gx_ref    : (T, Bp, 4H) f32   precomputed U(x_t)+b_U, gate order [i,f,o,g]
    Wt_ref    : (H, 4H)     bf16/f32 recurrent weight (transposed, no bias)
    h0_ref    : (Bp, H)     f32   initial hidden state (batch-padded, zeros pad)
    c0_ref    : (Bp, H)     f32   initial cell state
    h_out_ref : (T, Bp, H)  f32   time-major hidden states (full-tile stores)
    """
    T, Bp, H = h_out_ref.shape
    w_dtype = Wt_ref.dtype

    h0 = h0_ref[...]
    c0 = c0_ref[...]

    def step(t, carry):
        h, c = carry
        # Aligned (Bp, 4H) tile load + MXU matmul with f32 accumulation.
        gates = gx_ref[t] + jnp.dot(h.astype(w_dtype), Wt_ref[...],
                                    preferred_element_type=jnp.float32)
        # Gate order is [i, f, o, g]: one sigmoid slab + one tanh.
        sig = _sigmoid(gates[:, 0:3 * H])
        i_t = sig[:, 0 * H:1 * H]
        f_t = sig[:, 1 * H:2 * H]
        o_t = sig[:, 2 * H:3 * H]
        g_t = jnp.tanh(gates[:, 3 * H:4 * H])
        c_new = f_t * c + i_t * g_t
        h_new = o_t * jnp.tanh(c_new)
        h_out_ref[t] = h_new            # full (Bp, H) unmasked store
        return (h_new, c_new)

    # Bounded unroll: serial dependence gives no ILP beyond a short window.
    lax.fori_loop(0, T, step, (h0, c0), unroll=8)


def _reorder_gates(w, H):
    """Torch gate order [i, f, g, o] -> kernel order [i, f, o, g] (last axis)."""
    return jnp.concatenate(
        [w[..., 0 * H:1 * H], w[..., 1 * H:2 * H],
         w[..., 3 * H:4 * H], w[..., 2 * H:3 * H]], axis=-1)


def input_layer_forward(xb, params, *, recurrent_dtype=jnp.bfloat16):
    """xb: (B, T) int32 token ids -> (emb (B,T,D), h_all (B,T,H)), float32."""
    C, Ut, bU, Wt, h0, c0 = params
    B, T = xb.shape
    D = C.shape[1]
    H = h0.shape[-1]
    Bp = max(SUBLANE, ((B + SUBLANE - 1) // SUBLANE) * SUBLANE)

    # Embedding lookup is a pure memory gather; the serial LSTM body runs in
    # the Pallas kernel.
    # TODO(synk): the token-id -> embedding-row gather stays an XLA gather in
    # the wrapper; an in-kernel version would need a scalar-prefetch DMA gather.
    emb = jnp.take(C, xb, axis=0)                               # (B, T, D), module output
    # Time-major gather directly (cheap second gather instead of an HBM
    # transpose of emb).
    emb_tm = jnp.take(C, xb.T, axis=0)                          # (T, B, D)
    emb_tm = jnp.pad(emb_tm, ((0, 0), (0, Bp - B), (0, 0)))     # (T, Bp, D)

    # Reorder gate columns so i/f/o sigmoids form one contiguous slab.
    Ut_k = _reorder_gates(Ut, H)
    bU_k = _reorder_gates(bU, H)
    Wt_k = _reorder_gates(Wt, H).astype(recurrent_dtype)

    # Non-recurrent input projection in the wrapper (fuses with the gather;
    # K=24 would waste MXU contraction depth inside the kernel anyway).
    gx = (emb_tm.reshape(T * Bp, D) @ Ut_k + bU_k).reshape(T, Bp, 4 * H)
    gx = gx.astype(jnp.float32)

    # Zero-padded initial state rows (padded batch rows stay exactly zero-fed).
    h0_pad = jnp.pad(jnp.broadcast_to(h0, (B, H)), ((0, Bp - B), (0, 0)))
    c0_pad = jnp.pad(jnp.broadcast_to(c0, (B, H)), ((0, Bp - B), (0, 0)))

    itemsize = jnp.dtype(recurrent_dtype).itemsize
    io_bytes = (gx.size * 4 + Wt_k.size * itemsize
                + 2 * Bp * H * 4 + T * Bp * H * 4)
    vmem_limit = int(min(max(4 * io_bytes, 4 << 20), 96 << 20))
    cost = pl.CostEstimate(
        flops=2 * T * Bp * H * (4 * H) + 12 * T * Bp * H,
        transcendentals=5 * T * Bp * H,
        bytes_accessed=io_bytes,
    )

    # TODO(synk): for real H=1024 / long T, chunk T on an "arbitrary" grid axis
    # (gx streamed via BlockSpec, h/c in VMEM scratch) and shard independent
    # sequences over a leading "parallel" axis for v7x's 2 TensorCores.
    h_tm = pl.pallas_call(
        _lstm_recurrence_kernel,
        out_shape=jax.ShapeDtypeStruct((T, Bp, H), jnp.float32),
        compiler_params=pltpu.CompilerParams(vmem_limit_bytes=vmem_limit),
        cost_estimate=cost,
    )(gx, Wt_k, h0_pad, c0_pad)

    # Slice the batch padding off, then a single small transpose back to the
    # module's (B, T, H) layout.  (At real sizes, consume time-major downstream
    # instead of paying this transpose.)
    h_all = jnp.transpose(h_tm[:, :B, :], (1, 0, 2))            # (B, T, H)
    return emb, h_all


def make_params(key, vocab=vocab_size, hidden=N_HIDDEN, d_model=D_MODEL):
    """Parameter init matching the PyTorch module's shapes.

    nn.Linear weights are (out, in); stored transposed (in, out) for x @ W^T.
    Gate order is the torch/module order [i, f, g, o].
    """
    kC, kU, kbU, kW = jax.random.split(key, 4)
    bu = 1.0 / (d_model ** 0.5)   # nn.Linear(d_model, 4H) bound
    bw = 1.0 / (hidden ** 0.5)    # nn.Linear(hidden, 4H) bound
    C = jax.random.normal(kC, (vocab, d_model), jnp.float32)
    Ut = jax.random.uniform(kU, (d_model, 4 * hidden), jnp.float32, -bu, bu)
    bU = jax.random.uniform(kbU, (1, 4 * hidden), jnp.float32, -bu, bu)
    Wt = jax.random.uniform(kW, (hidden, 4 * hidden), jnp.float32, -bw, bw)
    h0 = 0.1 * jnp.ones((1, hidden), jnp.float32)
    c0 = 0.1 * jnp.ones((1, hidden), jnp.float32)
    return (C, Ut, bU, Wt, h0, c0)


def reference_forward(xb, params):
    """Pure-JAX reference mirroring the PyTorch loop, for validation."""
    C, Ut, bU, Wt, h0, c0 = params
    B, T = xb.shape
    H = h0.shape[-1]
    emb = jnp.take(C, xb, axis=0)
    h = jnp.broadcast_to(h0, (B, H))
    c = jnp.broadcast_to(c0, (B, H))

    def step(carry, x_t):
        h, c = carry
        gates = x_t @ Ut + bU + h @ Wt
        i_t = jax.nn.sigmoid(gates[:, 0 * H:1 * H])
        f_t = jax.nn.sigmoid(gates[:, 1 * H:2 * H])
        g_t = jnp.tanh(gates[:, 2 * H:3 * H])
        o_t = jax.nn.sigmoid(gates[:, 3 * H:4 * H])
        c = f_t * c + i_t * g_t
        h = o_t * jnp.tanh(c)
        return (h, c), h

    _, h_all = lax.scan(step, (h, c), jnp.transpose(emb, (1, 0, 2)))
    return emb, jnp.transpose(h_all, (1, 0, 2))


if __name__ == "__main__":
    B, T = 2, 8
    key = jax.random.PRNGKey(0)
    k_tok, k_par = jax.random.split(key)

    xb = jax.random.randint(k_tok, (B, T), 0, vocab_size, dtype=jnp.int32)
    params = make_params(k_par)

    emb_ref, h_ref = reference_forward(xb, params)
    h_ref = jax.block_until_ready(h_ref)

    # Tight correctness check: f32 recurrent weight path.
    emb32, h32 = input_layer_forward(xb, params, recurrent_dtype=jnp.float32)
    h32 = jax.block_until_ready(h32)
    emb32 = jax.block_until_ready(emb32)
    assert emb32.shape == (B, T, D_MODEL)
    assert h32.shape == (B, T, N_HIDDEN)
    assert jnp.allclose(emb32, emb_ref, atol=1e-5, rtol=1e-5)
    assert jnp.allclose(h32, h_ref, atol=2e-4, rtol=2e-4), float(
        jnp.max(jnp.abs(h32 - h_ref)))

    # Performance path: bf16 recurrent weight (MXU-native), f32 carries and
    # accumulation.  Looser tolerance covers only bf16 rounding of h @ W^T.
    emb16, h16 = input_layer_forward(xb, params, recurrent_dtype=jnp.bfloat16)
    h16 = jax.block_until_ready(h16)
    assert h16.shape == (B, T, N_HIDDEN)
    assert jnp.allclose(h16, h_ref, atol=3e-2, rtol=3e-2), float(
        jnp.max(jnp.abs(h16 - h_ref)))

    print("KERNEL_OK")
</pallas_src>

<mosaic_0001>
module attributes {stable_mosaic.version = 11 : i64} {
  func.func @_lstm_recurrence_kernel(%arg0: memref<8x8x512xf32, #tpu.memory_space<vmem>>, %arg1: memref<128x512xf32, #tpu.memory_space<vmem>>, %arg2: memref<8x128xf32, #tpu.memory_space<vmem>>, %arg3: memref<8x128xf32, #tpu.memory_space<vmem>>, %arg4: memref<8x8x128xf32, #tpu.memory_space<vmem>>) attributes {dimension_semantics = [], scalar_prefetch = 0 : i64, scratch_operands = 0 : i64, tpu.core_type = #tpu.core_type<tc>} {
    %c0 = arith.constant 0 : index
    %c0_0 = arith.constant 0 : index
    %0 = vector.load %arg2[%c0, %c0_0] : memref<8x128xf32, #tpu.memory_space<vmem>>, vector<8x128xf32>
    %c0_1 = arith.constant 0 : index
    %c0_2 = arith.constant 0 : index
    %1 = vector.load %arg3[%c0_1, %c0_2] : memref<8x128xf32, #tpu.memory_space<vmem>>, vector<8x128xf32>
    %c0_i32 = arith.constant 0 : i32
    %2 = arith.index_cast %c0_i32 : i32 to index
    %c0_3 = arith.constant 0 : index
    %c0_4 = arith.constant 0 : index
    %3 = vector.load %arg0[%2, %c0_3, %c0_4] : memref<8x8x512xf32, #tpu.memory_space<vmem>>, vector<1x8x512xf32>
    %4 = vector.shape_cast %3 : vector<1x8x512xf32> to vector<8x512xf32>
    %c0_5 = arith.constant 0 : index
    %c0_6 = arith.constant 0 : index
    %5 = vector.load %arg1[%c0_5, %c0_6] : memref<128x512xf32, #tpu.memory_space<vmem>>, vector<128x512xf32>
    %cst = arith.constant dense<0.000000e+00> : vector<8x512xf32>
    %6 = tpu.matmul %0, %5, %cst {dimension_numbers = #tpu.dot_dimension_numbers<[1], [0], [0], [1], [0, 0, 1, 1], [], []>} : vector<8x128xf32>, vector<128x512xf32>, vector<8x512xf32> -> vector<8x512xf32>
    %7 = arith.addf %4, %6 : vector<8x512xf32>
    %8 = vector.extract_strided_slice %7 {offsets = [0, 0], sizes = [8, 384], strides = [1, 1]} : vector<8x512xf32> to vector<8x384xf32>
    %cst_7 = arith.constant 5.000000e-01 : f32
    %9 = vector.broadcast %cst_7 : f32 to vector<8x384xf32>
    %10 = arith.mulf %9, %8 : vector<8x384xf32>
    %11 = math.tanh %10 : vector<8x384xf32>
    %cst_8 = arith.constant 5.000000e-01 : f32
    %12 = vector.broadcast %cst_8 : f32 to vector<8x384xf32>
    %13 = arith.mulf %12, %11 : vector<8x384xf32>
    %cst_9 = arith.constant 5.000000e-01 : f32
    %14 = vector.broadcast %cst_9 : f32 to vector<8x384xf32>
    %15 = arith.addf %13, %14 : vector<8x384xf32>
    %16 = vector.extract_strided_slice %15 {offsets = [0, 0], sizes = [8, 128], strides = [1, 1]} : vector<8x384xf32> to vector<8x128xf32>
    %17 = vector.extract_strided_slice %15 {offsets = [0, 128], sizes = [8, 128], strides = [1, 1]} : vector<8x384xf32> to vector<8x128xf32>
    %18 = vector.extract_strided_slice %15 {offsets = [0, 256], sizes = [8, 128], strides = [1, 1]} : vector<8x384xf32> to vector<8x128xf32>
    %19 = vector.extract_strided_slice %7 {offsets = [0, 384], sizes = [8, 128], strides = [1, 1]} : vector<8x512xf32> to vector<8x128xf32>
    %20 = math.tanh %19 : vector<8x128xf32>
    %21 = arith.mulf %17, %1 : vector<8x128xf32>
    %22 = arith.mulf %16, %20 : vector<8x128xf32>
    %23 = arith.addf %21, %22 : vector<8x128xf32>
    %24 = math.tanh %23 : vector<8x128xf32>
    %25 = arith.mulf %18, %24 : vector<8x128xf32>
    %26 = arith.index_cast %c0_i32 : i32 to index
    %c0_10 = arith.constant 0 : index
    %c0_11 = arith.constant 0 : index
    %27 = vector.load %arg4[%26, %c0_10, %c0_11] : memref<8x8x128xf32, #tpu.memory_space<vmem>>, vector<1x8x128xf32>
    %28 = vector.shape_cast %27 : vector<1x8x128xf32> to vector<8x128xf32>
    %29 = vector.shape_cast %25 : vector<8x128xf32> to vector<1x8x128xf32>
    tpu.vector_store %arg4[%26, %c0_10, %c0_11], %29 {strides = array<i32>} : memref<8x8x128xf32, #tpu.memory_space<vmem>>, vector<1x8x128xf32>,
    %c1_i32 = arith.constant 1 : i32
    %30 = arith.index_cast %c1_i32 : i32 to index
    %c0_12 = arith.constant 0 : index
    %c0_13 = arith.constant 0 : index
    %31 = vector.load %arg0[%30, %c0_12, %c0_13] : memref<8x8x512xf32, #tpu.memory_space<vmem>>, vector<1x8x512xf32>
    %32 = vector.shape_cast %31 : vector<1x8x512xf32> to vector<8x512xf32>
    %c0_14 = arith.constant 0 : index
    %c0_15 = arith.constant 0 : index
    %33 = vector.load %arg1[%c0_14, %c0_15] : memref<128x512xf32, #tpu.memory_space<vmem>>, vector<128x512xf32>
    %cst_16 = arith.constant dense<0.000000e+00> : vector<8x512xf32>
    %34 = tpu.matmul %25, %33, %cst_16 {dimension_numbers = #tpu.dot_dimension_numbers<[1], [0], [0], [1], [0, 0, 1, 1], [], []>} : vector<8x128xf32>, vector<128x512xf32>, vector<8x512xf32> -> vector<8x512xf32>
    %35 = arith.addf %32, %34 : vector<8x512xf32>
    %36 = vector.extract_strided_slice %35 {offsets = [0, 0], sizes = [8, 384], strides = [1, 1]} : vector<8x512xf32> to vector<8x384xf32>
    %cst_17 = arith.constant 5.000000e-01 : f32
    %37 = vector.broadcast %cst_17 : f32 to vector<8x384xf32>
    %38 = arith.mulf %37, %36 : vector<8x384xf32>
    %39 = math.tanh %38 : vector<8x384xf32>
    %cst_18 = arith.constant 5.000000e-01 : f32
    %40 = vector.broadcast %cst_18 : f32 to vector<8x384xf32>
    %41 = arith.mulf %40, %39 : vector<8x384xf32>
    %cst_19 = arith.constant 5.000000e-01 : f32
    %42 = vector.broadcast %cst_19 : f32 to vector<8x384xf32>
    %43 = arith.addf %41, %42 : vector<8x384xf32>
    %44 = vector.extract_strided_slice %43 {offsets = [0, 0], sizes = [8, 128], strides = [1, 1]} : vector<8x384xf32> to vector<8x128xf32>
    %45 = vector.extract_strided_slice %43 {offsets = [0, 128], sizes = [8, 128], strides = [1, 1]} : vector<8x384xf32> to vector<8x128xf32>
    %46 = vector.extract_strided_slice %43 {offsets = [0, 256], sizes = [8, 128], strides = [1, 1]} : vector<8x384xf32> to vector<8x128xf32>
    %47 = vector.extract_strided_slice %35 {offsets = [0, 384], sizes = [8, 128], strides = [1, 1]} : vector<8x512xf32> to vector<8x128xf32>
    %48 = math.tanh %47 : vector<8x128xf32>
    %49 = arith.mulf %45, %23 : vector<8x128xf32>
    %50 = arith.mulf %44, %48 : vector<8x128xf32>
    %51 = arith.addf %49, %50 : vector<8x128xf32>
    %52 = math.tanh %51 : vector<8x128xf32>
    %53 = arith.mulf %46, %52 : vector<8x128xf32>
    %54 = arith.index_cast %c1_i32 : i32 to index
    %c0_20 = arith.constant 0 : index
    %c0_21 = arith.constant 0 : index
    %55 = vector.load %arg4[%54, %c0_20, %c0_21] : memref<8x8x128xf32, #tpu.memory_space<vmem>>, vector<1x8x128xf32>
    %56 = vector.shape_cast %55 : vector<1x8x128xf32> to vector<8x128xf32>
    %57 = vector.shape_cast %53 : vector<8x128xf32> to vector<1x8x128xf32>
    tpu.vector_store %arg4[%54, %c0_20, %c0_21], %57 {strides = array<i32>} : memref<8x8x128xf32, #tpu.memory_space<vmem>>, vector<1x8x128xf32>,
    %c2_i32 = arith.constant 2 : i32
    %58 = arith.index_cast %c2_i32 : i32 to index
    %c0_22 = arith.constant 0 : index
    %c0_23 = arith.constant 0 : index
    %59 = vector.load %arg0[%58, %c0_22, %c0_23] : memref<8x8x512xf32, #tpu.memory_space<vmem>>, vector<1x8x512xf32>
    %60 = vector.shape_cast %59 : vector<1x8x512xf32> to vector<8x512xf32>
    %c0_24 = arith.constant 0 : index
    %c0_25 = arith.constant 0 : index
    %61 = vector.load %arg1[%c0_24, %c0_25] : memref<128x512xf32, #tpu.memory_space<vmem>>, vector<128x512xf32>
    %cst_26 = arith.constant dense<0.000000e+00> : vector<8x512xf32>
    %62 = tpu.matmul %53, %61, %cst_26 {dimension_numbers = #tpu.dot_dimension_numbers<[1], [0], [0], [1], [0, 0, 1, 1], [], []>} : vector<8x128xf32>, vector<128x512xf32>, vector<8x512xf32> -> vector<8x512xf32>
    %63 = arith.addf %60, %62 : vector<8x512xf32>
    %64 = vector.extract_strided_slice %63 {offsets = [0, 0], sizes = [8, 384], strides = [1, 1]} : vector<8x512xf32> to vector<8x384xf32>
    %cst_27 = arith.constant 5.000000e-01 : f32
    %65 = vector.broadcast %cst_27 : f32 to vector<8x384xf32>
    %66 = arith.mulf %65, %64 : vector<8x384xf32>
    %67 = math.tanh %66 : vector<8x384xf32>
    %cst_28 = arith.constant 5.000000e-01 : f32
    %68 = vector.broadcast %cst_28 : f32 to vector<8x384xf32>
    %69 = arith.mulf %68, %67 : vector<8x384xf32>
    %cst_29 = arith.constant 5.000000e-01 : f32
    %70 = vector.broadcast %cst_29 : f32 to vector<8x384xf32>
    %71 = arith.addf %69, %70 : vector<8x384xf32>
    %72 = vector.extract_strided_slice %71 {offsets = [0, 0], sizes = [8, 128], strides = [1, 1]} : vector<8x384xf32> to vector<8x128xf32>
    %73 = vector.extract_strided_slice %71 {offsets = [0, 128], sizes = [8, 128], strides = [1, 1]} : vector<8x384xf32> to vector<8x128xf32>
    %74 = vector.extract_strided_slice %71 {offsets = [0, 256], sizes = [8, 128], strides = [1, 1]} : vector<8x384xf32> to vector<8x128xf32>
    %75 = vector.extract_strided_slice %63 {offsets = [0, 384], sizes = [8, 128], strides = [1, 1]} : vector<8x512xf32> to vector<8x128xf32>
    %76 = math.tanh %75 : vector<8x128xf32>
    %77 = arith.mulf %73, %51 : vector<8x128xf32>
    %78 = arith.mulf %72, %76 : vector<8x128xf32>
    %79 = arith.addf %77, %78 : vector<8x128xf32>
    %80 = math.tanh %79 : vector<8x128xf32>
    %81 = arith.mulf %74, %80 : vector<8x128xf32>
    %82 = arith.index_cast %c2_i32 : i32 to index
    %c0_30 = arith.constant 0 : index
    %c0_31 = arith.constant 0 : index
    %83 = vector.load %arg4[%82, %c0_30, %c0_31] : memref<8x8x128xf32, #tpu.memory_space<vmem>>, vector<1x8x128xf32>
    %84 = vector.shape_cast %83 : vector<1x8x128xf32> to vector<8x128xf32>
    %85 = vector.shape_cast %81 : vector<8x128xf32> to vector<1x8x128xf32>
    tpu.vector_store %arg4[%82, %c0_30, %c0_31], %85 {strides = array<i32>} : memref<8x8x128xf32, #tpu.memory_space<vmem>>, vector<1x8x128xf32>,
    %c3_i32 = arith.constant 3 : i32
    %86 = arith.index_cast %c3_i32 : i32 to index
    %c0_32 = arith.constant 0 : index
    %c0_33 = arith.constant 0 : index
    %87 = vector.load %arg0[%86, %c0_32, %c0_33] : memref<8x8x512xf32, #tpu.memory_space<vmem>>, vector<1x8x512xf32>
    %88 = vector.shape_cast %87 : vector<1x8x512xf32> to vector<8x512xf32>
    %c0_34 = arith.constant 0 : index
    %c0_35 = arith.constant 0 : index
    %89 = vector.load %arg1[%c0_34, %c0_35] : memref<128x512xf32, #tpu.memory_space<vmem>>, vector<128x512xf32>
    %cst_36 = arith.constant dense<0.000000e+00> : vector<8x512xf32>
    %90 = tpu.matmul %81, %89, %cst_36 {dimension_numbers = #tpu.dot_dimension_numbers<[1], [0], [0], [1], [0, 0, 1, 1], [], []>} : vector<8x128xf32>, vector<128x512xf32>, vector<8x512xf32> -> vector<8x512xf32>
    %91 = arith.addf %88, %90 : vector<8x512xf32>
    %92 = vector.extract_strided_slice %91 {offsets = [0, 0], sizes = [8, 384], strides = [1, 1]} : vector<8x512xf32> to vector<8x384xf32>
    %cst_37 = arith.constant 5.000000e-01 : f32
    %93 = vector.broadcast %cst_37 : f32 to vector<8x384xf32>
    %94 = arith.mulf %93, %92 : vector<8x384xf32>
    %95 = math.tanh %94 : vector<8x384xf32>
    %cst_38 = arith.constant 5.000000e-01 : f32
    %96 = vector.broadcast %cst_38 : f32 to vector<8x384xf32>
    %97 = arith.mulf %96, %95 : vector<8x384xf32>
    %cst_39 = arith.constant 5.000000e-01 : f32
    %98 = vector.broadcast %cst_39 : f32 to vector<8x384xf32>
    %99 = arith.addf %97, %98 : vector<8x384xf32>
    %100 = vector.extract_strided_slice %99 {offsets = [0, 0], sizes = [8, 128], strides = [1, 1]} : vector<8x384xf32> to vector<8x128xf32>
    %101 = vector.extract_strided_slice %99 {offsets = [0, 128], sizes = [8, 128], strides = [1, 1]} : vector<8x384xf32> to vector<8x128xf32>
    %102 = vector.extract_strided_slice %99 {offsets = [0, 256], sizes = [8, 128], strides = [1, 1]} : vector<8x384xf32> to vector<8x128xf32>
    %103 = vector.extract_strided_slice %91 {offsets = [0, 384], sizes = [8, 128], strides = [1, 1]} : vector<8x512xf32> to vector<8x128xf32>
    %104 = math.tanh %103 : vector<8x128xf32>
    %105 = arith.mulf %101, %79 : vector<8x128xf32>
    %106 = arith.mulf %100, %104 : vector<8x128xf32>
    %107 = arith.addf %105, %106 : vector<8x128xf32>
    %108 = math.tanh %107 : vector<8x128xf32>
    %109 = arith.mulf %102, %108 : vector<8x128xf32>
    %110 = arith.index_cast %c3_i32 : i32 to index
    %c0_40 = arith.constant 0 : index
    %c0_41 = arith.constant 0 : index
    %111 = vector.load %arg4[%110, %c0_40, %c0_41] : memref<8x8x128xf32, #tpu.memory_space<vmem>>, vector<1x8x128xf32>
    %112 = vector.shape_cast %111 : vector<1x8x128xf32> to vector<8x128xf32>
    %113 = vector.shape_cast %109 : vector<8x128xf32> to vector<1x8x128xf32>
    tpu.vector_store %arg4[%110, %c0_40, %c0_41], %113 {strides = array<i32>} : memref<8x8x128xf32, #tpu.memory_space<vmem>>, vector<1x8x128xf32>,
    %c4_i32 = arith.constant 4 : i32
    %114 = arith.index_cast %c4_i32 : i32 to index
    %c0_42 = arith.constant 0 : index
    %c0_43 = arith.constant 0 : index
    %115 = vector.load %arg0[%114, %c0_42, %c0_43] : memref<8x8x512xf32, #tpu.memory_space<vmem>>, vector<1x8x512xf32>
    %116 = vector.shape_cast %115 : vector<1x8x512xf32> to vector<8x512xf32>
    %c0_44 = arith.constant 0 : index
    %c0_45 = arith.constant 0 : index
    %117 = vector.load %arg1[%c0_44, %c0_45] : memref<128x512xf32, #tpu.memory_space<vmem>>, vector<128x512xf32>
    %cst_46 = arith.constant dense<0.000000e+00> : vector<8x512xf32>
    %118 = tpu.matmul %109, %117, %cst_46 {dimension_numbers = #tpu.dot_dimension_numbers<[1], [0], [0], [1], [0, 0, 1, 1], [], []>} : vector<8x128xf32>, vector<128x512xf32>, vector<8x512xf32> -> vector<8x512xf32>
    %119 = arith.addf %116, %118 : vector<8x512xf32>
    %120 = vector.extract_strided_slice %119 {offsets = [0, 0], sizes = [8, 384], strides = [1, 1]} : vector<8x512xf32> to vector<8x384xf32>
    %cst_47 = arith.constant 5.000000e-01 : f32
    %121 = vector.broadcast %cst_47 : f32 to vector<8x384xf32>
    %122 = arith.mulf %121, %120 : vector<8x384xf32>
    %123 = math.tanh %122 : vector<8x384xf32>
    %cst_48 = arith.constant 5.000000e-01 : f32
    %124 = vector.broadcast %cst_48 : f32 to vector<8x384xf32>
    %125 = arith.mulf %124, %123 : vector<8x384xf32>
    %cst_49 = arith.constant 5.000000e-01 : f32
    %126 = vector.broadcast %cst_49 : f32 to vector<8x384xf32>
    %127 = arith.addf %125, %126 : vector<8x384xf32>
    %128 = vector.extract_strided_slice %127 {offsets = [0, 0], sizes = [8, 128], strides = [1, 1]} : vector<8x384xf32> to vector<8x128xf32>
    %129 = vector.extract_strided_slice %127 {offsets = [0, 128], sizes = [8, 128], strides = [1, 1]} : vector<8x384xf32> to vector<8x128xf32>
    %130 = vector.extract_strided_slice %127 {offsets = [0, 256], sizes = [8, 128], strides = [1, 1]} : vector<8x384xf32> to vector<8x128xf32>
    %131 = vector.extract_strided_slice %119 {offsets = [0, 384], sizes = [8, 128], strides = [1, 1]} : vector<8x512xf32> to vector<8x128xf32>
    %132 = math.tanh %131 : vector<8x128xf32>
    %133 = arith.mulf %129, %107 : vector<8x128xf32>
    %134 = arith.mulf %128, %132 : vector<8x128xf32>
    %135 = arith.addf %133, %134 : vector<8x128xf32>
    %136 = math.tanh %135 : vector<8x128xf32>
    %137 = arith.mulf %130, %136 : vector<8x128xf32>
    %138 = arith.index_cast %c4_i32 : i32 to index
    %c0_50 = arith.constant 0 : index
    %c0_51 = arith.constant 0 : index
    %139 = vector.load %arg4[%138, %c0_50, %c0_51] : memref<8x8x128xf32, #tpu.memory_space<vmem>>, vector<1x8x128xf32>
    %140 = vector.shape_cast %139 : vector<1x8x128xf32> to vector<8x128xf32>
    %141 = vector.shape_cast %137 : vector<8x128xf32> to vector<1x8x128xf32>
    tpu.vector_store %arg4[%138, %c0_50, %c0_51], %141 {strides = array<i32>} : memref<8x8x128xf32, #tpu.memory_space<vmem>>, vector<1x8x128xf32>,
    %c5_i32 = arith.constant 5 : i32
    %142 = arith.index_cast %c5_i32 : i32 to index
    %c0_52 = arith.constant 0 : index
    %c0_53 = arith.constant 0 : index
    %143 = vector.load %arg0[%142, %c0_52, %c0_53] : memref<8x8x512xf32, #tpu.memory_space<vmem>>, vector<1x8x512xf32>
    %144 = vector.shape_cast %143 : vector<1x8x512xf32> to vector<8x512xf32>
    %c0_54 = arith.constant 0 : index
    %c0_55 = arith.constant 0 : index
    %145 = vector.load %arg1[%c0_54, %c0_55] : memref<128x512xf32, #tpu.memory_space<vmem>>, vector<128x512xf32>
    %cst_56 = arith.constant dense<0.000000e+00> : vector<8x512xf32>
    %146 = tpu.matmul %137, %145, %cst_56 {dimension_numbers = #tpu.dot_dimension_numbers<[1], [0], [0], [1], [0, 0, 1, 1], [], []>} : vector<8x128xf32>, vector<128x512xf32>, vector<8x512xf32> -> vector<8x512xf32>
    %147 = arith.addf %144, %146 : vector<8x512xf32>
    %148 = vector.extract_strided_slice %147 {offsets = [0, 0], sizes = [8, 384], strides = [1, 1]} : vector<8x512xf32> to vector<8x384xf32>
    %cst_57 = arith.constant 5.000000e-01 : f32
    %149 = vector.broadcast %cst_57 : f32 to vector<8x384xf32>
    %150 = arith.mulf %149, %148 : vector<8x384xf32>
    %151 = math.tanh %150 : vector<8x384xf32>
    %cst_58 = arith.constant 5.000000e-01 : f32
    %152 = vector.broadcast %cst_58 : f32 to vector<8x384xf32>
    %153 = arith.mulf %152, %151 : vector<8x384xf32>
    %cst_59 = arith.constant 5.000000e-01 : f32
    %154 = vector.broadcast %cst_59 : f32 to vector<8x384xf32>
    %155 = arith.addf %153, %154 : vector<8x384xf32>
    %156 = vector.extract_strided_slice %155 {offsets = [0, 0], sizes = [8, 128], strides = [1, 1]} : vector<8x384xf32> to vector<8x128xf32>
    %157 = vector.extract_strided_slice %155 {offsets = [0, 128], sizes = [8, 128], strides = [1, 1]} : vector<8x384xf32> to vector<8x128xf32>
    %158 = vector.extract_strided_slice %155 {offsets = [0, 256], sizes = [8, 128], strides = [1, 1]} : vector<8x384xf32> to vector<8x128xf32>
    %159 = vector.extract_strided_slice %147 {offsets = [0, 384], sizes = [8, 128], strides = [1, 1]} : vector<8x512xf32> to vector<8x128xf32>
    %160 = math.tanh %159 : vector<8x128xf32>
    %161 = arith.mulf %157, %135 : vector<8x128xf32>
    %162 = arith.mulf %156, %160 : vector<8x128xf32>
    %163 = arith.addf %161, %162 : vector<8x128xf32>
    %164 = math.tanh %163 : vector<8x128xf32>
    %165 = arith.mulf %158, %164 : vector<8x128xf32>
    %166 = arith.index_cast %c5_i32 : i32 to index
    %c0_60 = arith.constant 0 : index
    %c0_61 = arith.constant 0 : index
    %167 = vector.load %arg4[%166, %c0_60, %c0_61] : memref<8x8x128xf32, #tpu.memory_space<vmem>>, vector<1x8x128xf32>
    %168 = vector.shape_cast %167 : vector<1x8x128xf32> to vector<8x128xf32>
    %169 = vector.shape_cast %165 : vector<8x128xf32> to vector<1x8x128xf32>
    tpu.vector_store %arg4[%166, %c0_60, %c0_61], %169 {strides = array<i32>} : memref<8x8x128xf32, #tpu.memory_space<vmem>>, vector<1x8x128xf32>,
    %c6_i32 = arith.constant 6 : i32
    %170 = arith.index_cast %c6_i32 : i32 to index
    %c0_62 = arith.constant 0 : index
    %c0_63 = arith.constant 0 : index
    %171 = vector.load %arg0[%170, %c0_62, %c0_63] : memref<8x8x512xf32, #tpu.memory_space<vmem>>, vector<1x8x512xf32>
    %172 = vector.shape_cast %171 : vector<1x8x512xf32> to vector<8x512xf32>
    %c0_64 = arith.constant 0 : index
    %c0_65 = arith.constant 0 : index
    %173 = vector.load %arg1[%c0_64, %c0_65] : memref<128x512xf32, #tpu.memory_space<vmem>>, vector<128x512xf32>
    %cst_66 = arith.constant dense<0.000000e+00> : vector<8x512xf32>
    %174 = tpu.matmul %165, %173, %cst_66 {dimension_numbers = #tpu.dot_dimension_numbers<[1], [0], [0], [1], [0, 0, 1, 1], [], []>} : vector<8x128xf32>, vector<128x512xf32>, vector<8x512xf32> -> vector<8x512xf32>
    %175 = arith.addf %172, %174 : vector<8x512xf32>
    %176 = vector.extract_strided_slice %175 {offsets = [0, 0], sizes = [8, 384], strides = [1, 1]} : vector<8x512xf32> to vector<8x384xf32>
    %cst_67 = arith.constant 5.000000e-01 : f32
    %177 = vector.broadcast %cst_67 : f32 to vector<8x384xf32>
    %178 = arith.mulf %177, %176 : vector<8x384xf32>
    %179 = math.tanh %178 : vector<8x384xf32>
    %cst_68 = arith.constant 5.000000e-01 : f32
    %180 = vector.broadcast %cst_68 : f32 to vector<8x384xf32>
    %181 = arith.mulf %180, %179 : vector<8x384xf32>
    %cst_69 = arith.constant 5.000000e-01 : f32
    %182 = vector.broadcast %cst_69 : f32 to vector<8x384xf32>
    %183 = arith.addf %181, %182 : vector<8x384xf32>
    %184 = vector.extract_strided_slice %183 {offsets = [0, 0], sizes = [8, 128], strides = [1, 1]} : vector<8x384xf32> to vector<8x128xf32>
    %185 = vector.extract_strided_slice %183 {offsets = [0, 128], sizes = [8, 128], strides = [1, 1]} : vector<8x384xf32> to vector<8x128xf32>
    %186 = vector.extract_strided_slice %183 {offsets = [0, 256], sizes = [8, 128], strides = [1, 1]} : vector<8x384xf32> to vector<8x128xf32>
    %187 = vector.extract_strided_slice %175 {offsets = [0, 384], sizes = [8, 128], strides = [1, 1]} : vector<8x512xf32> to vector<8x128xf32>
    %188 = math.tanh %187 : vector<8x128xf32>
    %189 = arith.mulf %185, %163 : vector<8x128xf32>
    %190 = arith.mulf %184, %188 : vector<8x128xf32>
    %191 = arith.addf %189, %190 : vector<8x128xf32>
    %192 = math.tanh %191 : vector<8x128xf32>
    %193 = arith.mulf %186, %192 : vector<8x128xf32>
    %194 = arith.index_cast %c6_i32 : i32 to index
    %c0_70 = arith.constant 0 : index
    %c0_71 = arith.constant 0 : index
    %195 = vector.load %arg4[%194, %c0_70, %c0_71] : memref<8x8x128xf32, #tpu.memory_space<vmem>>, vector<1x8x128xf32>
    %196 = vector.shape_cast %195 : vector<1x8x128xf32> to vector<8x128xf32>
    %197 = vector.shape_cast %193 : vector<8x128xf32> to vector<1x8x128xf32>
    tpu.vector_store %arg4[%194, %c0_70, %c0_71], %197 {strides = array<i32>} : memref<8x8x128xf32, #tpu.memory_space<vmem>>, vector<1x8x128xf32>,
    %c7_i32 = arith.constant 7 : i32
    %198 = arith.index_cast %c7_i32 : i32 to index
    %c0_72 = arith.constant 0 : index
    %c0_73 = arith.constant 0 : index
    %199 = vector.load %arg0[%198, %c0_72, %c0_73] : memref<8x8x512xf32, #tpu.memory_space<vmem>>, vector<1x8x512xf32>
    %200 = vector.shape_cast %199 : vector<1x8x512xf32> to vector<8x512xf32>
    %c0_74 = arith.constant 0 : index
    %c0_75 = arith.constant 0 : index
    %201 = vector.load %arg1[%c0_74, %c0_75] : memref<128x512xf32, #tpu.memory_space<vmem>>, vector<128x512xf32>
    %cst_76 = arith.constant dense<0.000000e+00> : vector<8x512xf32>
    %202 = tpu.matmul %193, %201, %cst_76 {dimension_numbers = #tpu.dot_dimension_numbers<[1], [0], [0], [1], [0, 0, 1, 1], [], []>} : vector<8x128xf32>, vector<128x512xf32>, vector<8x512xf32> -> vector<8x512xf32>
    %203 = arith.addf %200, %202 : vector<8x512xf32>
    %204 = vector.extract_strided_slice %203 {offsets = [0, 0], sizes = [8, 384], strides = [1, 1]} : vector<8x512xf32> to vector<8x384xf32>
    %cst_77 = arith.constant 5.000000e-01 : f32
    %205 = vector.broadcast %cst_77 : f32 to vector<8x384xf32>
    %206 = arith.mulf %205, %204 : vector<8x384xf32>
    %207 = math.tanh %206 : vector<8x384xf32>
    %cst_78 = arith.constant 5.000000e-01 : f32
    %208 = vector.broadcast %cst_78 : f32 to vector<8x384xf32>
    %209 = arith.mulf %208, %207 : vector<8x384xf32>
    %cst_79 = arith.constant 5.000000e-01 : f32
    %210 = vector.broadcast %cst_79 : f32 to vector<8x384xf32>
    %211 = arith.addf %209, %210 : vector<8x384xf32>
    %212 = vector.extract_strided_slice %211 {offsets = [0, 0], sizes = [8, 128], strides = [1, 1]} : vector<8x384xf32> to vector<8x128xf32>
    %213 = vector.extract_strided_slice %211 {offsets = [0, 128], sizes = [8, 128], strides = [1, 1]} : vector<8x384xf32> to vector<8x128xf32>
    %214 = vector.extract_strided_slice %211 {offsets = [0, 256], sizes = [8, 128], strides = [1, 1]} : vector<8x384xf32> to vector<8x128xf32>
    %215 = vector.extract_strided_slice %203 {offsets = [0, 384], sizes = [8, 128], strides = [1, 1]} : vector<8x512xf32> to vector<8x128xf32>
    %216 = math.tanh %215 : vector<8x128xf32>
    %217 = arith.mulf %213, %191 : vector<8x128xf32>
    %218 = arith.mulf %212, %216 : vector<8x128xf32>
    %219 = arith.addf %217, %218 : vector<8x128xf32>
    %220 = math.tanh %219 : vector<8x128xf32>
    %221 = arith.mulf %214, %220 : vector<8x128xf32>
    %222 = arith.index_cast %c7_i32 : i32 to index
    %c0_80 = arith.constant 0 : index
    %c0_81 = arith.constant 0 : index
    %223 = vector.load %arg4[%222, %c0_80, %c0_81] : memref<8x8x128xf32, #tpu.memory_space<vmem>>, vector<1x8x128xf32>
    %224 = vector.shape_cast %223 : vector<1x8x128xf32> to vector<8x128xf32>
    %225 = vector.shape_cast %221 : vector<8x128xf32> to vector<1x8x128xf32>
    tpu.vector_store %arg4[%222, %c0_80, %c0_81], %225 {strides = array<i32>} : memref<8x8x128xf32, #tpu.memory_space<vmem>>, vector<1x8x128xf32>,
    %c8_i32 = arith.constant 8 : i32
    return
  }
}

</mosaic_0001>

<bundles_post_ra>
// kernel: tpu_custom_call.1
= control target key start
LH: loop header
LB: loop body
LE: loop exit
PB: predicated region body
PF: predicated region fallthrough
CT: control target
= control target key end

     0   :  { %9 = vsyncpa [#allocation3], 0  ;;  %s3166_s0 = inlined_call_operand.hbm [shape: f32[8,8,512], index: 0, kind: input, shape index: {}]   ;;  %s3167_s1 = inlined_call_operand.hbm [shape: f32[128,512], index: 1, kind: input, shape index: {}]   ;;  %s3168_s2 = inlined_call_operand.hbm [shape: f32[8,128], index: 2, kind: input, shape index: {}]   ;;  %s3169_s3 = inlined_call_operand.vmem [shape: f32[8,128], index: 3, kind: input, shape index: {}]   ;;  %s3170_s4 = inlined_call_operand.hbm [shape: f32[8,8,128], index: 4, kind: output, shape index: {}]  }
   0x1   :  { %10 = vsyncpa [#allocation6], 0 }
   0x2   :  { %11 = vsyncpa [#allocation4], 0  ;;  %s2650_s15 = smov [#allocation5]   ;;  %s2651_s17 = smov [#allocation2]  }
   0x3   :  { %s29_s16 = sshll.u32 %s2650_s15, 4  ;;  %s17_s18 = sshll.u32 %s2651_s17, 4  ;;  %s30_s16 = int_to_ptr.vmem [resolvable:$true] %s29_s16  ;;  %s2684_s18 = int_to_ptr.vmem [resolvable:$true] %s17_s18 }
   0x4   :  { %s2556_s21 = scalar_lea.hbm %s3167_s1, 8192 }
   0x5   :  { %p2557_p0 = scmp.ne.s32.totalorder %s3167_s1, %s2556_s21  ;;  %p2560_p1 = scmp.lt.u32.totalorder %s2556_s21, %s3167_s1 }
   0x7   :  { %p2562_p2 = pnand %p2560_p1, %p2557_p0 }
   0x9   :  { %2565 = shalt.err (!%p2562_p2)
}
   0xa   :  { %s2566_s26 = scalar_lea.vmem %s30_s16, 8192  ;;  %p2571_p4 = scmp.lt.s32.totalorder %s30_s16, %s30_s16 }
   0xb   :  { %p2567_p3 = scmp.ne.s32.totalorder %s30_s16, %s2566_s26  ;;  %p2572_p5 = scmp.lt.s32.totalorder %s2566_s26, %s2566_s26 }
   0xd   :  { %p2573_p6 = por %p2572_p5, %p2571_p4 }
   0xf   :  { %p2574_p7 = pnand %p2573_p6, %p2567_p3 }
  0x11   :  { %2577 = shalt.err (!%p2574_p7)
}
  0x12   :  { %s2652_s27 = smov 512   ;;  %s2653_s28 = smov 32  }
  0x13   :  { %35 = dma.hbm_to_vmem [thread:$0]  %s3167_s1, 8192, %s30_s16, [#allocation6], %s2652_s27, %s2652_s27, %s2653_s28  }
  0x14   :  { %s2578_s7 = scalar_lea.hbm %s3166_s0, 4096 }
  0x15   :  { %p2579_p8 = scmp.ne.s32.totalorder %s3166_s0, %s2578_s7  ;;  %p2582_p9 = scmp.lt.u32.totalorder %s2578_s7, %s3166_s0 }
  0x17   :  { %p2584_p10 = pnand %p2582_p9, %p2579_p8 }
  0x19   :  { %2587 = shalt.err (!%p2584_p10)
}
  0x1a   :  { %s2588_s12 = scalar_lea.vmem %s2684_s18, 4096  ;;  %p2593_p12 = scmp.lt.s32.totalorder %s2684_s18, %s2684_s18 }
  0x1b   :  { %p2589_p11 = scmp.ne.s32.totalorder %s2684_s18, %s2588_s12  ;;  %p2594_p13 = scmp.lt.s32.totalorder %s2588_s12, %s2588_s12 }
  0x1d   :  { %p2595_p0 = por %p2594_p13, %p2593_p12 }
  0x1f   :  { %p2596_p1 = pnand %p2595_p0, %p2589_p11 }
  0x21   :  { %2599 = shalt.err (!%p2596_p1)
}
  0x22   :  { %23 = dma.hbm_to_vmem [thread:$0]  %s3166_s0, 4096, %s2684_s18, [#allocation3], %s2652_s27, %s2652_s27, %s2653_s28  }
  0x23   :  { %s2654_s14 = smov [#allocation7]   ;;  %s2600_s19 = scalar_lea.hbm %s3168_s2, 128 }
  0x24   :  { %s42_s15 = sshll.u32 %s2654_s14, 4  ;;  %p2601_p2 = scmp.ne.s32.totalorder %s3168_s2, %s2600_s19  ;;  %s43_s15 = int_to_ptr.vmem [resolvable:$true] %s42_s15 }
  0x25   :  { %p2604_p3 = scmp.lt.u32.totalorder %s2600_s19, %s3168_s2 }
  0x27   :  { %p2606_p4 = pnand %p2604_p3, %p2601_p2 }
  0x29   :  { %2609 = shalt.err (!%p2606_p4)
}
  0x2a   :  { %s2610_s24 = scalar_lea.vmem %s43_s15, 128  ;;  %p2615_p6 = scmp.lt.s32.totalorder %s43_s15, %s43_s15 }
  0x2b   :  { %p2611_p5 = scmp.ne.s32.totalorder %s43_s15, %s2610_s24  ;;  %p2616_p7 = scmp.lt.s32.totalorder %s2610_s24, %s2610_s24 }
  0x2d   :  { %p2617_p8 = por %p2616_p7, %p2615_p6 }
  0x2f   :  { %p2618_p9 = pnand %p2617_p8, %p2611_p5 }
  0x31   :  { %2621 = shalt.err (!%p2618_p9)
}
  0x32   :  { %45 = dma.hbm_to_vmem [thread:$0]  %s3168_s2, 128, %s43_s15, [#allocation6]  }
  0x33   :  { %2644 = dma.done.wait [#allocation3], 4096  }
  0x34   :  { %2645 = vsyncadd [#allocation3], 4294963200 }
  0x35   :  { %2646 = dma.done.wait [#allocation6], 8320  }
  0x36   :  { %2647 = vsyncadd [#allocation6], 4294958976  ;;  %v2655_v0 = vmov 0.0   ;;  %v64_v1 = vld [vmem:[#allocation5 + $0x8] sm:$0xff]  ;;  %v63_v3 = vld [vmem:[#allocation5] sm:$0xff] }
  0x37   :  { %191 = vmatprep.mubr.f32.mxu0 %v2655_v0  ;;  %262 = vmatprep.mubr.f32.mxu1 %v2655_v0  ;;  %v68_v2 = vld [vmem:[#allocation5 + $0x28] sm:$0xff]  ;;  %v67_v5 = vld [vmem:[#allocation5 + $0x20] sm:$0xff]  ;;  %v66_v12 = vld [vmem:[#allocation5 + $0x18] sm:$0xff] }
  0x38   :  { %v2729_v4 = vpack.c.bf16 %v68_v2, %v64_v1  ;;  %v72_v6 = vld [vmem:[#allocation5 + $0x48] sm:$0xff]  ;;  %v2731_v8 = vpack.c.bf16 %v67_v5, %v63_v3  ;;  %v71_v10 = vld [vmem:[#allocation5 + $0x40] sm:$0xff]  ;;  %v70_v13 = vld [vmem:[#allocation5 + $0x38] sm:$0xff] }
  0x39   :  { %v76_v7 = vld [vmem:[#allocation5 + $0x68] sm:$0xff]  ;;  %v75_v11 = vld [vmem:[#allocation5 + $0x60] sm:$0xff]  ;;  %v65_v14 = vld [vmem:[#allocation5 + $0x10] sm:$0xff]  ;;  %v2739_v17 = vpack.c.bf16 %v70_v13, %v66_v12 }
  0x3a   :  { %v2733_v9 = vpack.c.bf16 %v76_v7, %v72_v6  ;;  %1956 = vmatprep.subr.bf16.mxu0 %v2729_v4  ;;  %v69_v15 = vld [vmem:[#allocation5 + $0x30] sm:$0xff]  ;;  %v2737_v16 = vpack.c.bf16 %v75_v11, %v71_v10  ;;  %v80_v19 = vld [vmem:[#allocation5 + $0x88] sm:$0xff]  ;;  %v79_v21 = vld [vmem:[#allocation5 + $0x80] sm:$0xff] }
  0x3b   :  { %1958 = vmatpush1.bf16.msra.mxu0 %v2731_v8  ;;  %v2741_v18 = vpack.c.bf16 %v69_v15, %v65_v14  ;;  %v84_v20 = vld [vmem:[#allocation5 + $0xa8] sm:$0xff]  ;;  %v83_v23 = vld [vmem:[#allocation5 + $0xa0] sm:$0xff]  ;;  %v74_v24 = vld [vmem:[#allocation5 + $0x58] sm:$0xff]  ;;  %1988 = vmatprep.subr.bf16.mxu1 %v2739_v17 }
  0x3c   :  { %1960 = vmatprep.subr.bf16.mxu0 %v2733_v9  ;;  %v2744_v22 = vpack.c.bf16 %v84_v20, %v80_v19  ;;  %v78_v25 = vld [vmem:[#allocation5 + $0x78] sm:$0xff]  ;;  %v73_v27 = vld [vmem:[#allocation5 + $0x50] sm:$0xff]  ;;  %v88_v29 = vld [vmem:[#allocation5 + $0xc8] sm:$0xff]  ;;  %v2753_v32 = vpack.c.bf16 %v83_v23, %v79_v21 }
  0x3d   :  { %v2747_v26 = vpack.c.bf16 %v78_v25, %v74_v24  ;;  %v77_v28 = vld [vmem:[#allocation5 + $0x70] sm:$0xff]  ;;  %1990 = vmatpush1.bf16.msra.mxu1 %v2741_v18  ;;  %v92_v31 = vld [vmem:[#allocation5 + $0xe8] sm:$0xff]  ;;  %v82_v33 = vld [vmem:[#allocation5 + $0x98] sm:$0xff] }
  0x3e   :  { %v2750_v30 = vpack.c.bf16 %v77_v28, %v73_v27  ;;  %v86_v34 = vld [vmem:[#allocation5 + $0xb8] sm:$0xff]  ;;  %v81_v35 = vld [vmem:[#allocation5 + $0x90] sm:$0xff]  ;;  %v2757_v36 = vpack.c.bf16 %v92_v31, %v88_v29  ;;  %v87_v37 = vld [vmem:[#allocation5 + $0xc0] sm:$0xff] }
  0x3f   :  { %1962 = vmatpush1.bf16.msra.mxu0 %v2737_v16  ;;  %1992 = vmatprep.subr.bf16.mxu1 %v2747_v26  ;;  %v91_v38 = vld [vmem:[#allocation5 + $0xe0] sm:$0xff]  ;;  %v2759_v39 = vpack.c.bf16 %v86_v34, %v82_v33  ;;  %v85_v40 = vld [vmem:[#allocation5 + $0xb0] sm:$0xff]  ;;  %v96_v41 = vld [vmem:[#allocation5 + $0x108] sm:$0xff] }
  0x40   :  { %1964 = vmatprep.subr.bf16.mxu0 %v2744_v22  ;;  %v100_v42 = vld [vmem:[#allocation5 + $0x128] sm:$0xff]  ;;  %v90_v43 = vld [vmem:[#allocation5 + $0xd8] sm:$0xff]  ;;  %v2762_v44 = vpack.c.bf16 %v85_v40, %v81_v35  ;;  %v2765_v46 = vpack.c.bf16 %v91_v38, %v87_v37  ;;  %v95_v47 = vld [vmem:[#allocation5 + $0x100] sm:$0xff] }
  0x41   :  { %1994 = vmatpush1.bf16.msra.mxu1 %v2750_v30  ;;  %v94_v45 = vld [vmem:[#allocation5 + $0xf8] sm:$0xff]  ;;  %v89_v49 = vld [vmem:[#allocation5 + $0xd0] sm:$0xff]  ;;  %v2771_v51 = vpack.c.bf16 %v100_v42, %v96_v41  ;;  %v99_v52 = vld [vmem:[#allocation5 + $0x120] sm:$0xff] }
  0x42   :  { %1996 = vmatprep.subr.bf16.mxu1 %v2759_v39  ;;  %v2768_v48 = vpack.c.bf16 %v94_v45, %v90_v43  ;;  %v93_v50 = vld [vmem:[#allocation5 + $0xf0] sm:$0xff]  ;;  %v98_v53 = vld [vmem:[#allocation5 + $0x118] sm:$0xff]  ;;  %v104_v55 = vld [vmem:[#allocation5 + $0x148] sm:$0xff]  ;;  %v2777_v58 = vpack.c.bf16 %v99_v52, %v95_v47 }
  0x43   :  { %1966 = vmatpush1.bf16.msra.mxu0 %v2753_v32  ;;  %v102_v54 = vld [vmem:[#allocation5 + $0x138] sm:$0xff]  ;;  %v108_v56 = vld [vmem:[#allocation5 + $0x168] sm:$0xff]  ;;  %v2774_v57 = vpack.c.bf16 %v93_v50, %v89_v49  ;;  %v103_v59 = vld [vmem:[#allocation5 + $0x140] sm:$0xff] }
  0x44   :  { %1968 = vmatprep.subr.bf16.mxu0 %v2757_v36  ;;  %v2780_v60 = vpack.c.bf16 %v102_v54, %v98_v53  ;;  %v97_v61 = vld [vmem:[#allocation5 + $0x110] sm:$0xff]  ;;  %v2783_v63 = vpack.c.bf16 %v108_v56, %v104_v55  ;;  %v107_v1 = vld [vmem:[#allocation5 + $0x160] sm:$0xff]  ;;  %v106_v2 = vld [vmem:[#allocation5 + $0x158] sm:$0xff] }
  0x45   :  { %1998 = vmatpush1.bf16.msra.mxu1 %v2762_v44  ;;  %v101_v62 = vld [vmem:[#allocation5 + $0x130] sm:$0xff]  ;;  %v110_v3 = vld [vmem:[#allocation5 + $0x178] sm:$0xff]  ;;  %v112_v5 = vld [vmem:[#allocation5 + $0x188] sm:$0xff]  ;;  %v2789_v10 = vpack.c.bf16 %v107_v1, %v103_v59 }
  0x46   :  { %2000 = vmatprep.subr.bf16.mxu1 %v2768_v48  ;;  %v116_v6 = vld [vmem:[#allocation5 + $0x1a8] sm:$0xff]  ;;  %v2786_v7 = vpack.c.bf16 %v101_v62, %v97_v61  ;;  %v111_v11 = vld [vmem:[#allocation5 + $0x180] sm:$0xff]  ;;  %v2792_v12 = vpack.c.bf16 %v110_v3, %v106_v2  ;;  %v105_v13 = vld [vmem:[#allocation5 + $0x150] sm:$0xff] }
  0x47   :  { %1970 = vmatpush1.bf16.msra.mxu0 %v2765_v46  ;;  %v109_v14 = vld [vmem:[#allocation5 + $0x170] sm:$0xff]  ;;  %v2795_v15 = vpack.c.bf16 %v116_v6, %v112_v5  ;;  %v115_v19 = vld [vmem:[#allocation5 + $0x1a0] sm:$0xff]  ;;  %v114_v20 = vld [vmem:[#allocation5 + $0x198] sm:$0xff] }
  0x48   :  { %1972 = vmatprep.subr.bf16.mxu0 %v2771_v51  ;;  %v118_v21 = vld [vmem:[#allocation5 + $0x1b8] sm:$0xff]  ;;  %v120_v23 = vld [vmem:[#allocation5 + $0x1c8] sm:$0xff]  ;;  %v2798_v25 = vpack.c.bf16 %v109_v14, %v105_v13  ;;  %v2801_v27 = vpack.c.bf16 %v115_v19, %v111_v11  ;;  %v119_v28 = vld [vmem:[#allocation5 + $0x1c0] sm:$0xff] }
  0x49   :  { %2002 = vmatpush1.bf16.msra.mxu1 %v2774_v57  ;;  %v124_v24 = vld [vmem:[#allocation5 + $0x1e8] sm:$0xff]  ;;  %v2804_v29 = vpack.c.bf16 %v118_v21, %v114_v20  ;;  %v113_v31 = vld [vmem:[#allocation5 + $0x190] sm:$0xff]  ;;  %v123_v35 = vld [vmem:[#allocation5 + $0x1e0] sm:$0xff] }
  0x4a   :  { %2004 = vmatprep.subr.bf16.mxu1 %v2780_v60  ;;  %v117_v33 = vld [vmem:[#allocation5 + $0x1b0] sm:$0xff]  ;;  %v2807_v34 = vpack.c.bf16 %v124_v24, %v120_v23  ;;  %v122_v37 = vld [vmem:[#allocation5 + $0x1d8] sm:$0xff]  ;;  %v2813_v41 = vpack.c.bf16 %v123_v35, %v119_v28  ;;  %v57_v49 = vld [vmem:[#allocation7] sm:$0xff] }
  0x4b   :  { %1974 = vmatpush1.bf16.msra.mxu0 %v2777_v58  ;;  %v126_v38 = vld [vmem:[#allocation5 + $0x1f8] sm:$0xff]  ;;  %v2810_v40 = vpack.c.bf16 %v117_v33, %v113_v31  ;;  %v121_v43 = vld [vmem:[#allocation5 + $0x1d0] sm:$0xff]  ;;  %v59_v50 = vld [vmem:[#allocation2] sm:$0xff] }
  0x4c   :  { %1976 = vmatprep.subr.bf16.mxu0 %v2783_v63  ;;  %v2816_v42 = vpack.c.bf16 %v126_v38, %v122_v37  ;;  %v125_v45 = vld [vmem:[#allocation5 + $0x1f0] sm:$0xff]  ;;  %v60_v52 = vld [vmem:[#allocation2 + $0x8] sm:$0xff]  ;;  %v62_v59 = vld [vmem:[#allocation2 + $0x18] sm:$0xff] }
  0x4d   :  { %2006 = vmatpush1.bf16.msra.mxu1 %v2786_v7  ;;  %v2820_v47 = vpack.c.bf16 %v125_v45, %v121_v43  ;;  %v61_v5 = vld [vmem:[#allocation2 + $0x10] sm:$0xff]  ;;  %v58_v24 = vld [vmem:[%s3169_s3] sm:$0xff]  ;;  %s2656_s3 = smov [#allocation8]  }
  0x4e   :  { %2008 = vmatprep.subr.bf16.mxu1 %v2792_v12  ;;  %s1942_s26 = sshll.u32 %s2656_s3, 4  ;;  %s1943_s26 = int_to_ptr.vmem [resolvable:$true] %s1942_s26 }
  0x4f   :  { %1978 = vmatpush1.bf16.msra.mxu0 %v2789_v10  ;;  %s2622_s27 = scalar_lea.vmem %s1943_s26, 1024  ;;  %p2627_p11 = scmp.lt.s32.totalorder %s1943_s26, %s1943_s26 }
  0x50   :  { %1980 = vmatprep.subr.bf16.mxu0 %v2795_v15  ;;  %p2623_p10 = scmp.ne.s32.totalorder %s1943_s26, %s2622_s27  ;;  %p2628_p12 = scmp.lt.s32.totalorder %s2622_s27, %s2622_s27 }
  0x51   :  { %2010 = vmatpush1.bf16.msra.mxu1 %v2798_v25 }
  0x52   :  { %2012 = vmatprep.subr.bf16.mxu1 %v2804_v29  ;;  %p2629_p13 = por %p2628_p12, %p2627_p11 }
  0x53   :  { %1982 = vmatpush1.bf16.msra.mxu0 %v2801_v27 }
  0x54   :  { %1984 = vmatprep.subr.bf16.mxu0 %v2807_v34  ;;  %p2630_p0 = pnand %p2629_p13, %p2623_p10 }
  0x55   :  { %2014 = vmatpush1.bf16.msra.mxu1 %v2810_v40 }
  0x56   :  { %2016 = vmatprep.subr.bf16.mxu1 %v2816_v42 }
  0x57   :  { %1986 = vmatpush1.bf16.msra.mxu0 %v2813_v41 }
  0x58   :  { %2020 = vmatprep.subr.bf16.mxu0 %v2729_v4 }
  0x59   :  { %2018 = vmatpush1.bf16.msra.mxu1 %v2820_v47 }
  0x5a   :  { %192 = vmatmul.mubr.f32.vlgmr.msra.gmra.mrb[0].mxu0 %v57_v49  ;;  %2052 = vmatprep.subr.bf16.mxu1 %v2739_v17 }
  0x5b   :  { %2022 = vmatpush1.bf16.msra.mxu0 %v2731_v8  ;;  %425 = vmatprep.mubr.f32.mxu0 %v2655_v0 }
  0x5c   :  { %2024 = vmatprep.subr.bf16.mxu0 %v2733_v9  ;;  %263 = vmatmul.mubr.f32.vlgmr.msra.gmra.mrb[0].mxu1 %v57_v49 }
  0x5d   :  { %2054 = vmatpush1.bf16.msra.mxu1 %v2741_v18  ;;  %496 = vmatprep.mubr.f32.mxu1 %v2655_v0 }
  0x5e   :  { %2056 = vmatprep.subr.bf16.mxu1 %v2747_v26 }
  0x5f   :  { %2026 = vmatpush1.bf16.msra.mxu0 %v2737_v16 }
  0x60   :  { %2028 = vmatprep.subr.bf16.mxu0 %v2744_v22 }
  0x61   :  { %2058 = vmatpush1.bf16.msra.mxu1 %v2750_v30 }
  0x62   :  { %2060 = vmatprep.subr.bf16.mxu1 %v2759_v39 }
  0x63   :  { %2030 = vmatpush1.bf16.msra.mxu0 %v2753_v32 }
  0x64   :  { %2032 = vmatprep.subr.bf16.mxu0 %v2757_v36 }
  0x65   :  { %2062 = vmatpush1.bf16.msra.mxu1 %v2762_v44 }
  0x66   :  { %2064 = vmatprep.subr.bf16.mxu1 %v2768_v48 }
  0x67   :  { %2034 = vmatpush1.bf16.msra.mxu0 %v2765_v46 }
  0x68   :  { %2036 = vmatprep.subr.bf16.mxu0 %v2771_v51 }
  0x69   :  { %2066 = vmatpush1.bf16.msra.mxu1 %v2774_v57 }
  0x6a   :  { %2068 = vmatprep.subr.bf16.mxu1 %v2780_v60 }
  0x6b   :  { %2038 = vmatpush1.bf16.msra.mxu0 %v2777_v58 }
  0x6c   :  { %2040 = vmatprep.subr.bf16.mxu0 %v2783_v63 }
  0x6d   :  { %2070 = vmatpush1.bf16.msra.mxu1 %v2786_v7 }
  0x6e   :  { %2072 = vmatprep.subr.bf16.mxu1 %v2792_v12 }
  0x6f   :  { %2042 = vmatpush1.bf16.msra.mxu0 %v2789_v10 }
  0x70   :  { %2044 = vmatprep.subr.bf16.mxu0 %v2795_v15 }
  0x71   :  { %2074 = vmatpush1.bf16.msra.mxu1 %v2798_v25 }
  0x72   :  { %2076 = vmatprep.subr.bf16.mxu1 %v2804_v29 }
  0x73   :  { %2046 = vmatpush1.bf16.msra.mxu0 %v2801_v27 }
  0x74   :  { %2048 = vmatprep.subr.bf16.mxu0 %v2807_v34 }
  0x75   :  { %2078 = vmatpush1.bf16.msra.mxu1 %v2810_v40 }
  0x76   :  { %2080 = vmatprep.subr.bf16.mxu1 %v2816_v42 }
  0x77   :  { %2050 = vmatpush1.bf16.msra.mxu0 %v2813_v41 }
  0x78   :  { %2084 = vmatprep.subr.bf16.mxu0 %v2729_v4 }
  0x79   :  { %2082 = vmatpush1.bf16.msra.mxu1 %v2820_v47 }
  0x7a   :  { %2116 = vmatprep.subr.bf16.mxu1 %v2739_v17 }
 0x12d   :  { %v193_v53 = vpop.f32.mrb[0].mxu0 }
 0x12e   :  { %v269_v54 = vadd.f32 %v193_v53, %v59_v50  ;;  %v195_v55 = vpop.f32.mrb[1].mxu0  ;;  %v293_v50 = vld [vmem:[#allocation2 + $0x20] sm:$0xff] }
 0x12f   :  { %v270_v56 = vadd.f32 %v195_v55, %v60_v52  ;;  %v264_v62 = vpop.f32.mrb[0].mxu1  ;;  %v294_v52 = vld [vmem:[#allocation2 + $0x28] sm:$0xff] }
 0x130   :  { %v273_v61 = vmul.f32 0.5, %v269_v54  ;;  %v266_v2 = vpop.f32.mrb[1].mxu1  ;;  %v271_v6 = vadd.f32 %v264_v62, %v61_v5  ;;  %v296_v62 = vld [vmem:[#allocation2 + $0x38] sm:$0xff]  ;;  %v295_v5 = vld [vmem:[#allocation2 + $0x30] sm:$0xff] }
 0x131   :  { %v274_v1 = vmul.f32 0.5, %v270_v56  ;;  %v272_v3 = vadd.f32 %v266_v2, %v62_v59 }
 0x132   :  { %2476 = vtanh.f32 %v273_v61  ;;  %v275_v11 = vmul.f32 0.5, %v271_v6 }
 0x133   :  { %2478 = vtanh.f32 %v274_v1 }
 0x134   :  { %2480 = vtanh.f32 %v272_v3 }
 0x135   :  { %2482 = vtanh.f32 %v275_v11 }
 0x13c   :  { %v2477_v13 = vpop.eup %2476 }
 0x13d   :  { %v2479_v14 = vpop.eup %2478  ;;  %v279_v19 = vmul.f32 0.5, %v2477_v13 }
 0x13e   :  { %v2481_v20 = vpop.eup %2480  ;;  %v280_v21 = vmul.f32 0.5, %v2479_v14 }
 0x13f   :  { %v282_v23 = vadd.f32 0.5, %v279_v19  ;;  %v2483_v37 = vpop.eup %2482 }
 0x140   :  { %v283_v28 = vadd.f32 0.5, %v280_v21  ;;  %v281_v38 = vmul.f32 0.5, %v2483_v37 }
 0x141   :  { %v287_v31 = vmul.f32 %v2481_v20, %v282_v23 }
 0x142   :  { %v286_v33 = vmul.f32 %v283_v28, %v58_v24  ;;  %v284_v43 = vadd.f32 0.5, %v281_v38 }
 0x144   :  { %v2864_v35 = vadd.f32 %v287_v31, %v286_v33 }
 0x146   :  { %2484 = vtanh.f32 %v2864_v35 }
 0x150   :  { %v2485_v45 = vpop.eup %2484 }
 0x151   :  { %v290_v49 = vmul.f32 %v2485_v45, %v284_v43  ;;  %v1007_v45 = vld [vmem:[#allocation5 + $0x28] sm:$0xff] }
 0x153   :  { %291 = vst [vmem:[#allocation8] sm:$0xff] %v290_v49  ;;  %426 = vmatmul.mubr.f32.vlgmr.msra.gmra.mrb[2].mxu0 %v290_v49  ;;  %497 = vmatmul.mubr.f32.vlgmr.msra.gmra.mrb[2].mxu1 %v290_v49  ;;  %v1005_v49 = vld [vmem:[#allocation5 + $0x18] sm:$0xff] }
 0x154   :  { %2086 = vmatpush1.bf16.msra.mxu0 %v2731_v8  ;;  %2118 = vmatpush1.bf16.msra.mxu1 %v2741_v18 }
 0x155   :  { %2088 = vmatprep.subr.bf16.mxu0 %v2733_v9  ;;  %2120 = vmatprep.subr.bf16.mxu1 %v2747_v26 }
 0x156   :  { %660 = vmatprep.mubr.f32.mxu0 %v2655_v0  ;;  %731 = vmatprep.mubr.f32.mxu1 %v2655_v0 }
 0x158   :  { %2090 = vmatpush1.bf16.msra.mxu0 %v2737_v16  ;;  %2122 = vmatpush1.bf16.msra.mxu1 %v2750_v30 }
 0x159   :  { %2092 = vmatprep.subr.bf16.mxu0 %v2744_v22  ;;  %2124 = vmatprep.subr.bf16.mxu1 %v2759_v39 }
 0x15c   :  { %2094 = vmatpush1.bf16.msra.mxu0 %v2753_v32  ;;  %2126 = vmatpush1.bf16.msra.mxu1 %v2762_v44 }
 0x15d   :  { %2096 = vmatprep.subr.bf16.mxu0 %v2757_v36  ;;  %2128 = vmatprep.subr.bf16.mxu1 %v2768_v48 }
 0x160   :  { %2098 = vmatpush1.bf16.msra.mxu0 %v2765_v46  ;;  %2130 = vmatpush1.bf16.msra.mxu1 %v2774_v57 }
 0x161   :  { %2100 = vmatprep.subr.bf16.mxu0 %v2771_v51  ;;  %2132 = vmatprep.subr.bf16.mxu1 %v2780_v60 }
 0x164   :  { %2102 = vmatpush1.bf16.msra.mxu0 %v2777_v58  ;;  %2134 = vmatpush1.bf16.msra.mxu1 %v2786_v7 }
 0x165   :  { %2104 = vmatprep.subr.bf16.mxu0 %v2783_v63  ;;  %2136 = vmatprep.subr.bf16.mxu1 %v2792_v12 }
 0x168   :  { %2106 = vmatpush1.bf16.msra.mxu0 %v2789_v10  ;;  %2138 = vmatpush1.bf16.msra.mxu1 %v2798_v25 }
 0x169   :  { %2108 = vmatprep.subr.bf16.mxu0 %v2795_v15  ;;  %2140 = vmatprep.subr.bf16.mxu1 %v2804_v29 }
 0x16c   :  { %2110 = vmatpush1.bf16.msra.mxu0 %v2801_v27  ;;  %2142 = vmatpush1.bf16.msra.mxu1 %v2810_v40 }
 0x16d   :  { %2112 = vmatprep.subr.bf16.mxu0 %v2807_v34  ;;  %2144 = vmatprep.subr.bf16.mxu1 %v2816_v42 }
 0x170   :  { %2114 = vmatpush1.bf16.msra.mxu0 %v2813_v41  ;;  %2146 = vmatpush1.bf16.msra.mxu1 %v2820_v47 }
 0x171   :  { %2148 = vmatprep.subr.bf16.mxu0 %v2729_v4  ;;  %2180 = vmatprep.subr.bf16.mxu1 %v2739_v17 }
 0x226   :  { %v427_v53 = vpop.f32.mrb[2].mxu0  ;;  %v498_v54 = vpop.f32.mrb[2].mxu1 }
 0x227   :  { %v503_v55 = vadd.f32 %v427_v53, %v293_v50  ;;  %v429_v56 = vpop.f32.mrb[3].mxu0  ;;  %v500_v59 = vpop.f32.mrb[3].mxu1  ;;  %v505_v6 = vadd.f32 %v498_v54, %v295_v5  ;;  %v1002_v53 = vld [vmem:[#allocation5] sm:$0xff] }
 0x228   :  { %v504_v61 = vadd.f32 %v429_v56, %v294_v52  ;;  %v506_v3 = vadd.f32 %v500_v59, %v296_v62  ;;  %v1009_v52 = vld [vmem:[#allocation5 + $0x38] sm:$0xff]  ;;  %v1006_v54 = vld [vmem:[#allocation5 + $0x20] sm:$0xff]  ;;  %v1004_v59 = vld [vmem:[#allocation5 + $0x10] sm:$0xff] }
 0x229   :  { %v507_v1 = vmul.f32 0.5, %v503_v55  ;;  %v509_v4 = vmul.f32 0.5, %v505_v6  ;;  %v2945_v55 = vpack.c.bf16 %v1009_v52, %v1005_v49  ;;  %v2947_v56 = vpack.c.bf16 %v1006_v54, %v1002_v53  ;;  %v1017_v6 = vld [vmem:[#allocation5 + $0x78] sm:$0xff]  ;;  %v1042_v52 = vld [vmem:[#allocation5 + $0x140] sm:$0xff] }
 0x22a   :  { %v508_v2 = vmul.f32 0.5, %v504_v61  ;;  %v1008_v61 = vld [vmem:[#allocation5 + $0x30] sm:$0xff]  ;;  %v1049_v49 = vld [vmem:[#allocation5 + $0x178] sm:$0xff]  ;;  %v1046_v53 = vld [vmem:[#allocation5 + $0x160] sm:$0xff] }
 0x22b   :  { %2486 = vtanh.f32 %v507_v1  ;;  %v2950_v62 = vpack.c.bf16 %v1008_v61, %v1004_v59  ;;  %v1011_v1 = vld [vmem:[#allocation5 + $0x48] sm:$0xff]  ;;  %v3007_v59 = vpack.c.bf16 %v1046_v53, %v1042_v52  ;;  %v1044_v61 = vld [vmem:[#allocation5 + $0x150] sm:$0xff] }
 0x22c   :  { %2488 = vtanh.f32 %v508_v2  ;;  %v1015_v2 = vld [vmem:[#allocation5 + $0x68] sm:$0xff] }
 0x22d   :  { %2490 = vtanh.f32 %v506_v3  ;;  %v1013_v3 = vld [vmem:[#allocation5 + $0x58] sm:$0xff]  ;;  %v2955_v5 = vpack.c.bf16 %v1015_v2, %v1011_v1  ;;  %v1048_v1 = vld [vmem:[#allocation5 + $0x170] sm:$0xff]  ;;  %v1051_v2 = vld [vmem:[#allocation5 + $0x188] sm:$0xff] }
 0x22e   :  { %2492 = vtanh.f32 %v509_v4  ;;  %v1010_v4 = vld [vmem:[#allocation5 + $0x40] sm:$0xff] }
 0x235   :  { %v2487_v11 = vpop.eup %2486 }
 0x236   :  { %v513_v17 = vmul.f32 0.5, %v2487_v11  ;;  %v2489_v13 = vpop.eup %2488  ;;  %v1014_v11 = vld [vmem:[#allocation5 + $0x60] sm:$0xff] }
 0x237   :  { %v514_v19 = vmul.f32 0.5, %v2489_v13  ;;  %v2491_v20 = vpop.eup %2490  ;;  %v2959_v13 = vpack.c.bf16 %v1014_v11, %v1010_v4  ;;  %v1053_v4 = vld [vmem:[#allocation5 + $0x198] sm:$0xff] }
 0x238   :  { %v516_v14 = vadd.f32 0.5, %v513_v17  ;;  %v2493_v31 = vpop.eup %2492  ;;  %v2957_v17 = vpack.c.bf16 %v1017_v6, %v1013_v3  ;;  %v3010_v3 = vpack.c.bf16 %v1048_v1, %v1044_v61  ;;  %v1055_v6 = vld [vmem:[#allocation5 + $0x1a8] sm:$0xff]  ;;  %v1057_v11 = vld [vmem:[#allocation5 + $0x1b8] sm:$0xff]  ;;  %v765_v61 = vld [vmem:[#allocation2 + $0x70] sm:$0xff] }
 0x239   :  { %v517_v21 = vadd.f32 0.5, %v514_v19  ;;  %v515_v33 = vmul.f32 0.5, %v2493_v31  ;;  %v1016_v19 = vld [vmem:[#allocation5 + $0x70] sm:$0xff]  ;;  %v1025_v31 = vld [vmem:[#allocation5 + $0xb8] sm:$0xff] }
 0x23a   :  { %v521_v23 = vmul.f32 %v2491_v20, %v516_v14  ;;  %v1012_v14 = vld [vmem:[#allocation5 + $0x50] sm:$0xff] }
 0x23b   :  { %v520_v24 = vmul.f32 %v517_v21, %v2864_v35  ;;  %v518_v37 = vadd.f32 0.5, %v515_v33  ;;  %v1003_v35 = vld [vmem:[#allocation5 + $0x8] sm:$0xff]  ;;  %v2962_v20 = vpack.c.bf16 %v1016_v19, %v1012_v14  ;;  %v1018_v33 = vld [vmem:[#allocation5 + $0x80] sm:$0xff]  ;;  %v3014_v14 = vpack.c.bf16 %v1055_v6, %v1051_v2 }
 0x23c   :  { %v2943_v50 = vpack.c.bf16 %v1007_v45, %v1003_v35  ;;  %v1019_v21 = vld [vmem:[#allocation5 + $0x88] sm:$0xff]  ;;  %v1045_v35 = vld [vmem:[#allocation5 + $0x158] sm:$0xff]  ;;  %v3016_v19 = vpack.c.bf16 %v1057_v11, %v1053_v4 }
 0x23d   :  { %v2902_v28 = vadd.f32 %v521_v23, %v520_v24  ;;  %v1023_v23 = vld [vmem:[#allocation5 + $0xa8] sm:$0xff]  ;;  %v1021_v24 = vld [vmem:[#allocation5 + $0x98] sm:$0xff]  ;;  %v3005_v54 = vpack.c.bf16 %v1049_v49, %v1045_v35 }
 0x23e   :  { %v766_v35 = vld [vmem:[#allocation2 + $0x78] sm:$0xff] }
 0x23f   :  { %2494 = vtanh.f32 %v2902_v28 }
 0x249   :  { %v2495_v38 = vpop.eup %2494 }
 0x24a   :  { %v524_v43 = vmul.f32 %v2495_v38, %v518_v37  ;;  %v1022_v37 = vld [vmem:[#allocation5 + $0xa0] sm:$0xff]  ;;  %v2969_v38 = vpack.c.bf16 %v1025_v31, %v1021_v24  ;;  %v1052_v24 = vld [vmem:[#allocation5 + $0x190] sm:$0xff] }
 0x24c   :  { %526 = vst [vmem:[#allocation8 + $0x8] sm:$0xff] %v524_v43  ;;  %661 = vmatmul.mubr.f32.vlgmr.msra.gmra.mrb[4].mxu0 %v524_v43  ;;  %732 = vmatmul.mubr.f32.vlgmr.msra.gmra.mrb[4].mxu1 %v524_v43  ;;  %v2971_v43 = vpack.c.bf16 %v1022_v37, %v1018_v33  ;;  %v1056_v33 = vld [vmem:[#allocation5 + $0x1b0] sm:$0xff]  ;;  %v1059_v37 = vld [vmem:[#allocation5 + $0x1c8] sm:$0xff] }
 0x24d   :  { %2150 = vmatpush1.bf16.msra.mxu0 %v2731_v8  ;;  %2182 = vmatpush1.bf16.msra.mxu1 %v2741_v18  ;;  %v528_v8 = vld [vmem:[#allocation2 + $0x40] sm:$0xff] }
 0x24e   :  { %2152 = vmatprep.subr.bf16.mxu0 %v2733_v9  ;;  %2184 = vmatprep.subr.bf16.mxu1 %v2747_v26  ;;  %v529_v9 = vld [vmem:[#allocation2 + $0x48] sm:$0xff] }
 0x24f   :  { %895 = vmatprep.mubr.f32.mxu0 %v2655_v0  ;;  %966 = vmatprep.mubr.f32.mxu1 %v2655_v0 }
 0x251   :  { %2154 = vmatpush1.bf16.msra.mxu0 %v2737_v16  ;;  %2186 = vmatpush1.bf16.msra.mxu1 %v2750_v30 }
 0x252   :  { %2156 = vmatprep.subr.bf16.mxu0 %v2744_v22  ;;  %2188 = vmatprep.subr.bf16.mxu1 %v2759_v39 }
 0x255   :  { %2158 = vmatpush1.bf16.msra.mxu0 %v2753_v32  ;;  %2190 = vmatpush1.bf16.msra.mxu1 %v2762_v44 }
 0x256   :  { %2160 = vmatprep.subr.bf16.mxu0 %v2757_v36  ;;  %2192 = vmatprep.subr.bf16.mxu1 %v2768_v48  ;;  %v531_v36 = vld [vmem:[#allocation2 + $0x58] sm:$0xff]  ;;  %v530_v48 = vld [vmem:[#allocation2 + $0x50] sm:$0xff] }
 0x259   :  { %2162 = vmatpush1.bf16.msra.mxu0 %v2765_v46  ;;  %2194 = vmatpush1.bf16.msra.mxu1 %v2774_v57 }
 0x25a   :  { %2164 = vmatprep.subr.bf16.mxu0 %v2771_v51  ;;  %2196 = vmatprep.subr.bf16.mxu1 %v2780_v60 }
 0x25d   :  { %2166 = vmatpush1.bf16.msra.mxu0 %v2777_v58  ;;  %2198 = vmatpush1.bf16.msra.mxu1 %v2786_v7 }
 0x25e   :  { %2168 = vmatprep.subr.bf16.mxu0 %v2783_v63  ;;  %2200 = vmatprep.subr.bf16.mxu1 %v2792_v12 }
 0x261   :  { %2170 = vmatpush1.bf16.msra.mxu0 %v2789_v10  ;;  %2202 = vmatpush1.bf16.msra.mxu1 %v2798_v25 }
 0x262   :  { %2172 = vmatprep.subr.bf16.mxu0 %v2795_v15  ;;  %2204 = vmatprep.subr.bf16.mxu1 %v2804_v29 }
 0x265   :  { %2174 = vmatpush1.bf16.msra.mxu0 %v2801_v27  ;;  %2206 = vmatpush1.bf16.msra.mxu1 %v2810_v40 }
 0x266   :  { %2176 = vmatprep.subr.bf16.mxu0 %v2807_v34  ;;  %2208 = vmatprep.subr.bf16.mxu1 %v2816_v42 }
 0x269   :  { %2178 = vmatpush1.bf16.msra.mxu0 %v2813_v41  ;;  %2210 = vmatpush1.bf16.msra.mxu1 %v2820_v47 }
 0x26a   :  { %2212 = vmatprep.subr.bf16.mxu0 %v2943_v50  ;;  %2244 = vmatprep.subr.bf16.mxu1 %v2945_v55 }
 0x31f   :  { %v662_v16 = vpop.f32.mrb[4].mxu0  ;;  %v733_v18 = vpop.f32.mrb[4].mxu1 }
 0x320   :  { %v738_v22 = vadd.f32 %v662_v16, %v528_v8  ;;  %v664_v26 = vpop.f32.mrb[5].mxu0  ;;  %v735_v30 = vpop.f32.mrb[5].mxu1  ;;  %v740_v51 = vadd.f32 %v733_v18, %v530_v48  ;;  %v1020_v8 = vld [vmem:[#allocation5 + $0x90] sm:$0xff]  ;;  %v1027_v18 = vld [vmem:[#allocation5 + $0xc8] sm:$0xff] }
 0x321   :  { %v739_v32 = vadd.f32 %v664_v26, %v529_v9  ;;  %v741_v46 = vadd.f32 %v735_v30, %v531_v36  ;;  %v1024_v9 = vld [vmem:[#allocation5 + $0xb0] sm:$0xff]  ;;  %v1029_v26 = vld [vmem:[#allocation5 + $0xd8] sm:$0xff]  ;;  %v1026_v36 = vld [vmem:[#allocation5 + $0xc0] sm:$0xff] }
 0x322   :  { %v742_v39 = vmul.f32 0.5, %v738_v22  ;;  %v744_v57 = vmul.f32 0.5, %v740_v51  ;;  %v2974_v16 = vpack.c.bf16 %v1024_v9, %v1020_v8  ;;  %v1031_v22 = vld [vmem:[#allocation5 + $0xe8] sm:$0xff]  ;;  %v1028_v48 = vld [vmem:[#allocation5 + $0xd0] sm:$0xff]  ;;  %v3023_v9 = vpack.c.bf16 %v1056_v33, %v1052_v24 }
 0x323   :  { %v743_v44 = vmul.f32 0.5, %v739_v32  ;;  %v2979_v30 = vpack.c.bf16 %v1031_v22, %v1027_v18  ;;  %v1033_v32 = vld [vmem:[#allocation5 + $0xf8] sm:$0xff]  ;;  %v1032_v51 = vld [vmem:[#allocation5 + $0xf0] sm:$0xff]  ;;  %v1063_v8 = vld [vmem:[#allocation5 + $0x1e8] sm:$0xff] }
 0x324   :  { %2496 = vtanh.f32 %v742_v39  ;;  %v1030_v39 = vld [vmem:[#allocation5 + $0xe0] sm:$0xff]  ;;  %v3025_v18 = vpack.c.bf16 %v1063_v8, %v1059_v37  ;;  %v1061_v22 = vld [vmem:[#allocation5 + $0x1d8] sm:$0xff] }
 0x325   :  { %2498 = vtanh.f32 %v743_v44  ;;  %v2981_v44 = vpack.c.bf16 %v1033_v32, %v1029_v26  ;;  %v1065_v26 = vld [vmem:[#allocation5 + $0x1f8] sm:$0xff]  ;;  %v1058_v32 = vld [vmem:[#allocation5 + $0x1c0] sm:$0xff] }
 0x326   :  { %2500 = vtanh.f32 %v741_v46  ;;  %v2983_v46 = vpack.c.bf16 %v1030_v39, %v1026_v36  ;;  %v3027_v36 = vpack.c.bf16 %v1065_v26, %v1061_v22  ;;  %v1062_v39 = vld [vmem:[#allocation5 + $0x1e0] sm:$0xff] }
 0x327   :  { %2502 = vtanh.f32 %v744_v57  ;;  %v2986_v57 = vpack.c.bf16 %v1032_v51, %v1028_v48  ;;  %v1060_v48 = vld [vmem:[#allocation5 + $0x1d0] sm:$0xff] }
 0x328   :  { %v1064_v51 = vld [vmem:[#allocation5 + $0x1f0] sm:$0xff] }
 0x32e   :  { %v2497_v58 = vpop.eup %2496 }
 0x32f   :  { %v748_v60 = vmul.f32 0.5, %v2497_v58  ;;  %v2499_v63 = vpop.eup %2498  ;;  %v1035_v58 = vld [vmem:[#allocation5 + $0x108] sm:$0xff] }
 0x330   :  { %v749_v10 = vmul.f32 0.5, %v2499_v63  ;;  %v2501_v12 = vpop.eup %2500  ;;  %v1037_v63 = vld [vmem:[#allocation5 + $0x118] sm:$0xff] }
 0x331   :  { %v751_v7 = vadd.f32 0.5, %v748_v60  ;;  %v2503_v34 = vpop.eup %2502  ;;  %v1039_v60 = vld [vmem:[#allocation5 + $0x128] sm:$0xff] }
 0x332   :  { %v752_v15 = vadd.f32 0.5, %v749_v10  ;;  %v750_v40 = vmul.f32 0.5, %v2503_v34  ;;  %v1041_v10 = vld [vmem:[#allocation5 + $0x138] sm:$0xff]  ;;  %v1036_v34 = vld [vmem:[#allocation5 + $0x110] sm:$0xff] }
 0x333   :  { %v756_v25 = vmul.f32 %v2501_v12, %v751_v7  ;;  %v2991_v7 = vpack.c.bf16 %v1039_v60, %v1035_v58  ;;  %v1034_v12 = vld [vmem:[#allocation5 + $0x100] sm:$0xff]  ;;  %v3030_v58 = vpack.c.bf16 %v1062_v39, %v1058_v32  ;;  %v3034_v60 = vpack.c.bf16 %v1064_v51, %v1060_v48 }
 0x334   :  { %v755_v27 = vmul.f32 %v752_v15, %v2902_v28  ;;  %v753_v41 = vadd.f32 0.5, %v750_v40  ;;  %v2967_v28 = vpack.c.bf16 %v1023_v23, %v1019_v21  ;;  %v1038_v15 = vld [vmem:[#allocation5 + $0x120] sm:$0xff]  ;;  %v1040_v40 = vld [vmem:[#allocation5 + $0x130] sm:$0xff] }
 0x335   :  { %v1050_v21 = vld [vmem:[#allocation5 + $0x180] sm:$0xff] }
 0x336   :  { %v2938_v29 = vadd.f32 %v756_v25, %v755_v27  ;;  %v2993_v25 = vpack.c.bf16 %v1041_v10, %v1037_v63  ;;  %v2995_v27 = vpack.c.bf16 %v1038_v15, %v1034_v12  ;;  %v1054_v23 = vld [vmem:[#allocation5 + $0x1a0] sm:$0xff]  ;;  %v764_v10 = vld [vmem:[#allocation2 + $0x68] sm:$0xff] }
 0x337   :  { %v3019_v31 = vpack.c.bf16 %v1054_v23, %v1050_v21  ;;  %v763_v63 = vld [vmem:[#allocation2 + $0x60] sm:$0xff] }
 0x338   :  { %2504 = vtanh.f32 %v2938_v29 }
 0x342   :  { %v2505_v42 = vpop.eup %2504 }
 0x343   :  { %v759_v47 = vmul.f32 %v2505_v42, %v753_v41  ;;  %v2998_v41 = vpack.c.bf16 %v1040_v40, %v1036_v34  ;;  %v1043_v42 = vld [vmem:[#allocation5 + $0x148] sm:$0xff] }
 0x345   :  { %761 = vst [vmem:[#allocation8 + $0x10] sm:$0xff] %v759_v47  ;;  %896 = vmatmul.mubr.f32.vlgmr.msra.gmra.mrb[6].mxu0 %v759_v47  ;;  %967 = vmatmul.mubr.f32.vlgmr.msra.gmra.mrb[6].mxu1 %v759_v47  ;;  %v1047_v47 = vld [vmem:[#allocation5 + $0x168] sm:$0xff] }
 0x346   :  { %1130 = vmatprep.mubr.f32.mxu0 %v2655_v0  ;;  %1201 = vmatprep.mubr.f32.mxu1 %v2655_v0  ;;  %v3003_v45 = vpack.c.bf16 %v1047_v47, %v1043_v42 }
 0x347   :  { %2214 = vmatpush1.bf16.msra.mxu0 %v2947_v56  ;;  %2246 = vmatpush1.bf16.msra.mxu1 %v2950_v62 }
 0x348   :  { %2216 = vmatprep.subr.bf16.mxu0 %v2955_v5  ;;  %2248 = vmatprep.subr.bf16.mxu1 %v2957_v17 }
 0x34b   :  { %2218 = vmatpush1.bf16.msra.mxu0 %v2959_v13  ;;  %2250 = vmatpush1.bf16.msra.mxu1 %v2962_v20 }
 0x34c   :  { %2220 = vmatprep.subr.bf16.mxu0 %v2967_v28  ;;  %2252 = vmatprep.subr.bf16.mxu1 %v2969_v38 }
 0x34f   :  { %2222 = vmatpush1.bf16.msra.mxu0 %v2971_v43  ;;  %2254 = vmatpush1.bf16.msra.mxu1 %v2974_v16 }
 0x350   :  { %2224 = vmatprep.subr.bf16.mxu0 %v2979_v30  ;;  %2256 = vmatprep.subr.bf16.mxu1 %v2981_v44 }
 0x353   :  { %2226 = vmatpush1.bf16.msra.mxu0 %v2983_v46  ;;  %2258 = vmatpush1.bf16.msra.mxu1 %v2986_v57 }
 0x354   :  { %2228 = vmatprep.subr.bf16.mxu0 %v2991_v7  ;;  %2260 = vmatprep.subr.bf16.mxu1 %v2993_v25 }
 0x357   :  { %2230 = vmatpush1.bf16.msra.mxu0 %v2995_v27  ;;  %2262 = vmatpush1.bf16.msra.mxu1 %v2998_v41 }
 0x358   :  { %2232 = vmatprep.subr.bf16.mxu0 %v3003_v45  ;;  %2264 = vmatprep.subr.bf16.mxu1 %v3005_v54 }
 0x35b   :  { %2234 = vmatpush1.bf16.msra.mxu0 %v3007_v59  ;;  %2266 = vmatpush1.bf16.msra.mxu1 %v3010_v3 }
 0x35c   :  { %2236 = vmatprep.subr.bf16.mxu0 %v3014_v14  ;;  %2268 = vmatprep.subr.bf16.mxu1 %v3016_v19 }
 0x35f   :  { %2238 = vmatpush1.bf16.msra.mxu0 %v3019_v31  ;;  %2270 = vmatpush1.bf16.msra.mxu1 %v3023_v9 }
 0x360   :  { %2240 = vmatprep.subr.bf16.mxu0 %v3025_v18  ;;  %2272 = vmatprep.subr.bf16.mxu1 %v3027_v36 }
 0x363   :  { %2242 = vmatpush1.bf16.msra.mxu0 %v3030_v58  ;;  %2274 = vmatpush1.bf16.msra.mxu1 %v3034_v60 }
 0x364   :  { %2276 = vmatprep.subr.bf16.mxu0 %v2943_v50  ;;  %2308 = vmatprep.subr.bf16.mxu1 %v2945_v55 }
 0x418   :  { %v897_v12 = vpop.f32.mrb[6].mxu0  ;;  %v968_v15 = vpop.f32.mrb[6].mxu1 }
 0x419   :  { %v973_v34 = vadd.f32 %v897_v12, %v763_v63  ;;  %v899_v40 = vpop.f32.mrb[7].mxu0  ;;  %v970_v42 = vpop.f32.mrb[7].mxu1  ;;  %v975_v1 = vadd.f32 %v968_v15, %v765_v61  ;;  %v999_v63 = vld [vmem:[#allocation2 + $0x88] sm:$0xff] }
 0x41a   :  { %v974_v47 = vadd.f32 %v899_v40, %v764_v10  ;;  %v976_v53 = vadd.f32 %v970_v42, %v766_v35 }
 0x41b   :  { %v977_v49 = vmul.f32 0.5, %v973_v34  ;;  %v979_v2 = vmul.f32 0.5, %v975_v1 }
 0x41c   :  { %v978_v52 = vmul.f32 0.5, %v974_v47  ;;  %v1001_v47 = vld [vmem:[#allocation2 + $0x98] sm:$0xff] }
 0x41d   :  { %2506 = vtanh.f32 %v977_v49 }
 0x41e   :  { %2508 = vtanh.f32 %v978_v52 }
 0x41f   :  { %2510 = vtanh.f32 %v976_v53  ;;  %v1000_v53 = vld [vmem:[#allocation2 + $0x90] sm:$0xff] }
 0x420   :  { %2512 = vtanh.f32 %v979_v2 }
 0x427   :  { %v2507_v6 = vpop.eup %2506 }
 0x428   :  { %v983_v4 = vmul.f32 0.5, %v2507_v6  ;;  %v2509_v11 = vpop.eup %2508 }
 0x429   :  { %v984_v23 = vmul.f32 0.5, %v2509_v11  ;;  %v2511_v24 = vpop.eup %2510 }
 0x42a   :  { %v986_v21 = vadd.f32 0.5, %v983_v4  ;;  %v2513_v26 = vpop.eup %2512 }
 0x42b   :  { %v987_v33 = vadd.f32 0.5, %v984_v23  ;;  %v985_v32 = vmul.f32 0.5, %v2513_v26 }
 0x42c   :  { %v991_v37 = vmul.f32 %v2511_v24, %v986_v21 }
 0x42d   :  { %v990_v8 = vmul.f32 %v987_v33, %v2938_v29  ;;  %v988_v39 = vadd.f32 0.5, %v985_v32  ;;  %v998_v29 = vld [vmem:[#allocation2 + $0x80] sm:$0xff] }
 0x42f   :  { %v3042_v22 = vadd.f32 %v991_v37, %v990_v8 }
 0x431   :  { %2514 = vtanh.f32 %v3042_v22 }
 0x43b   :  { %v2515_v48 = vpop.eup %2514 }
 0x43c   :  { %v994_v51 = vmul.f32 %v2515_v48, %v988_v39 }
 0x43e   :  { %996 = vst [vmem:[#allocation8 + $0x18] sm:$0xff] %v994_v51  ;;  %1131 = vmatmul.mubr.f32.vlgmr.msra.gmra.mrb[8].mxu0 %v994_v51  ;;  %1202 = vmatmul.mubr.f32.vlgmr.msra.gmra.mrb[8].mxu1 %v994_v51 }
 0x43f   :  { %2278 = vmatpush1.bf16.msra.mxu0 %v2947_v56  ;;  %2310 = vmatpush1.bf16.msra.mxu1 %v2950_v62 }
 0x440   :  { %2280 = vmatprep.subr.bf16.mxu0 %v2955_v5  ;;  %2312 = vmatprep.subr.bf16.mxu1 %v2957_v17 }
 0x441   :  { %1365 = vmatprep.mubr.f32.mxu0 %v2655_v0  ;;  %1436 = vmatprep.mubr.f32.mxu1 %v2655_v0 }
 0x443   :  { %2282 = vmatpush1.bf16.msra.mxu0 %v2959_v13  ;;  %2314 = vmatpush1.bf16.msra.mxu1 %v2962_v20 }
 0x444   :  { %2284 = vmatprep.subr.bf16.mxu0 %v2967_v28  ;;  %2316 = vmatprep.subr.bf16.mxu1 %v2969_v38 }
 0x447   :  { %2286 = vmatpush1.bf16.msra.mxu0 %v2971_v43  ;;  %2318 = vmatpush1.bf16.msra.mxu1 %v2974_v16 }
 0x448   :  { %2288 = vmatprep.subr.bf16.mxu0 %v2979_v30  ;;  %2320 = vmatprep.subr.bf16.mxu1 %v2981_v44 }
 0x44b   :  { %2290 = vmatpush1.bf16.msra.mxu0 %v2983_v46  ;;  %2322 = vmatpush1.bf16.msra.mxu1 %v2986_v57 }
 0x44c   :  { %2292 = vmatprep.subr.bf16.mxu0 %v2991_v7  ;;  %2324 = vmatprep.subr.bf16.mxu1 %v2993_v25 }
 0x44f   :  { %2294 = vmatpush1.bf16.msra.mxu0 %v2995_v27  ;;  %2326 = vmatpush1.bf16.msra.mxu1 %v2998_v41 }
 0x450   :  { %2296 = vmatprep.subr.bf16.mxu0 %v3003_v45  ;;  %2328 = vmatprep.subr.bf16.mxu1 %v3005_v54 }
 0x453   :  { %2298 = vmatpush1.bf16.msra.mxu0 %v3007_v59  ;;  %2330 = vmatpush1.bf16.msra.mxu1 %v3010_v3 }
 0x454   :  { %2300 = vmatprep.subr.bf16.mxu0 %v3014_v14  ;;  %2332 = vmatprep.subr.bf16.mxu1 %v3016_v19 }
 0x457   :  { %2302 = vmatpush1.bf16.msra.mxu0 %v3019_v31  ;;  %2334 = vmatpush1.bf16.msra.mxu1 %v3023_v9 }
 0x458   :  { %2304 = vmatprep.subr.bf16.mxu0 %v3025_v18  ;;  %2336 = vmatprep.subr.bf16.mxu1 %v3027_v36 }
 0x45b   :  { %2306 = vmatpush1.bf16.msra.mxu0 %v3030_v58  ;;  %2338 = vmatpush1.bf16.msra.mxu1 %v3034_v60 }
 0x45c   :  { %2340 = vmatprep.subr.bf16.mxu0 %v2943_v50  ;;  %2372 = vmatprep.subr.bf16.mxu1 %v2945_v55 }
 0x511   :  { %v1132_v10 = vpop.f32.mrb[8].mxu0  ;;  %v1203_v12 = vpop.f32.mrb[8].mxu1 }
 0x512   :  { %v1208_v15 = vadd.f32 %v1132_v10, %v998_v29  ;;  %v1134_v34 = vpop.f32.mrb[9].mxu0  ;;  %v1205_v40 = vpop.f32.mrb[9].mxu1  ;;  %v1210_v61 = vadd.f32 %v1203_v12, %v1000_v53  ;;  %v1234_v29 = vld [vmem:[#allocation2 + $0xa8] sm:$0xff] }
 0x513   :  { %v1209_v42 = vadd.f32 %v1134_v34, %v999_v63  ;;  %v1211_v52 = vadd.f32 %v1205_v40, %v1001_v47 }
 0x514   :  { %v1212_v35 = vmul.f32 0.5, %v1208_v15  ;;  %v1214_v1 = vmul.f32 0.5, %v1210_v61 }
 0x515   :  { %v1213_v49 = vmul.f32 0.5, %v1209_v42  ;;  %v1236_v42 = vld [vmem:[#allocation2 + $0xb8] sm:$0xff] }
 0x516   :  { %2516 = vtanh.f32 %v1212_v35 }
 0x517   :  { %2518 = vtanh.f32 %v1213_v49 }
 0x518   :  { %2520 = vtanh.f32 %v1211_v52  ;;  %v1235_v52 = vld [vmem:[#allocation2 + $0xb0] sm:$0xff] }
 0x519   :  { %2522 = vtanh.f32 %v1214_v1 }
 0x520   :  { %v2517_v2 = vpop.eup %2516 }
 0x521   :  { %v1218_v6 = vmul.f32 0.5, %v2517_v2  ;;  %v2519_v4 = vpop.eup %2518 }
 0x522   :  { %v1219_v21 = vmul.f32 0.5, %v2519_v4  ;;  %v2521_v23 = vpop.eup %2520 }
 0x523   :  { %v1221_v11 = vadd.f32 0.5, %v1218_v6  ;;  %v2523_v26 = vpop.eup %2522 }
 0x524   :  { %v1222_v24 = vadd.f32 0.5, %v1219_v21  ;;  %v1220_v32 = vmul.f32 0.5, %v2523_v26 }
 0x525   :  { %v1226_v33 = vmul.f32 %v2521_v23, %v1221_v11 }
 0x526   :  { %v1225_v37 = vmul.f32 %v1222_v24, %v3042_v22  ;;  %v1223_v39 = vadd.f32 0.5, %v1220_v32  ;;  %v1233_v22 = vld [vmem:[#allocation2 + $0xa0] sm:$0xff] }
 0x528   :  { %v3080_v8 = vadd.f32 %v1226_v33, %v1225_v37 }
 0x52a   :  { %2524 = vtanh.f32 %v3080_v8 }
 0x534   :  { %v2525_v48 = vpop.eup %2524 }
 0x535   :  { %v1229_v51 = vmul.f32 %v2525_v48, %v1223_v39 }
 0x537   :  { %1231 = vst [vmem:[#allocation8 + $0x20] sm:$0xff] %v1229_v51  ;;  %1366 = vmatmul.mubr.f32.vlgmr.msra.gmra.mrb[10].mxu0 %v1229_v51  ;;  %1437 = vmatmul.mubr.f32.vlgmr.msra.gmra.mrb[10].mxu1 %v1229_v51 }
 0x538   :  { %2342 = vmatpush1.bf16.msra.mxu0 %v2947_v56  ;;  %2374 = vmatpush1.bf16.msra.mxu1 %v2950_v62 }
 0x539   :  { %2344 = vmatprep.subr.bf16.mxu0 %v2955_v5  ;;  %2376 = vmatprep.subr.bf16.mxu1 %v2957_v17 }
 0x53a   :  { %1600 = vmatprep.mubr.f32.mxu0 %v2655_v0  ;;  %1671 = vmatprep.mubr.f32.mxu1 %v2655_v0 }
 0x53c   :  { %2346 = vmatpush1.bf16.msra.mxu0 %v2959_v13  ;;  %2378 = vmatpush1.bf16.msra.mxu1 %v2962_v20 }
 0x53d   :  { %2348 = vmatprep.subr.bf16.mxu0 %v2967_v28  ;;  %2380 = vmatprep.subr.bf16.mxu1 %v2969_v38 }
 0x540   :  { %2350 = vmatpush1.bf16.msra.mxu0 %v2971_v43  ;;  %2382 = vmatpush1.bf16.msra.mxu1 %v2974_v16 }
 0x541   :  { %2352 = vmatprep.subr.bf16.mxu0 %v2979_v30  ;;  %2384 = vmatprep.subr.bf16.mxu1 %v2981_v44 }
 0x544   :  { %2354 = vmatpush1.bf16.msra.mxu0 %v2983_v46  ;;  %2386 = vmatpush1.bf16.msra.mxu1 %v2986_v57 }
 0x545   :  { %2356 = vmatprep.subr.bf16.mxu0 %v2991_v7  ;;  %2388 = vmatprep.subr.bf16.mxu1 %v2993_v25 }
 0x548   :  { %2358 = vmatpush1.bf16.msra.mxu0 %v2995_v27  ;;  %2390 = vmatpush1.bf16.msra.mxu1 %v2998_v41 }
 0x549   :  { %2360 = vmatprep.subr.bf16.mxu0 %v3003_v45  ;;  %2392 = vmatprep.subr.bf16.mxu1 %v3005_v54 }
 0x54c   :  { %2362 = vmatpush1.bf16.msra.mxu0 %v3007_v59  ;;  %2394 = vmatpush1.bf16.msra.mxu1 %v3010_v3 }
 0x54d   :  { %2364 = vmatprep.subr.bf16.mxu0 %v3014_v14  ;;  %2396 = vmatprep.subr.bf16.mxu1 %v3016_v19 }
 0x550   :  { %2366 = vmatpush1.bf16.msra.mxu0 %v3019_v31  ;;  %2398 = vmatpush1.bf16.msra.mxu1 %v3023_v9 }
 0x551   :  { %2368 = vmatprep.subr.bf16.mxu0 %v3025_v18  ;;  %2400 = vmatprep.subr.bf16.mxu1 %v3027_v36 }
 0x554   :  { %2370 = vmatpush1.bf16.msra.mxu0 %v3030_v58  ;;  %2402 = vmatpush1.bf16.msra.mxu1 %v3034_v60 }
 0x555   :  { %2404 = vmatprep.subr.bf16.mxu0 %v2943_v50  ;;  %2436 = vmatprep.subr.bf16.mxu1 %v2945_v55 }
 0x60a   :  { %v1367_v63 = vpop.f32.mrb[10].mxu0  ;;  %v1438_v10 = vpop.f32.mrb[10].mxu1 }
 0x60b   :  { %v1443_v12 = vadd.f32 %v1367_v63, %v1233_v22  ;;  %v1369_v15 = vpop.f32.mrb[11].mxu0  ;;  %v1440_v34 = vpop.f32.mrb[11].mxu1  ;;  %v1445_v53 = vadd.f32 %v1438_v10, %v1235_v52 }
 0x60c   :  { %v1444_v40 = vadd.f32 %v1369_v15, %v1234_v29  ;;  %v1446_v49 = vadd.f32 %v1440_v34, %v1236_v42  ;;  %v1705_v42 = vld [vmem:[#allocation2 + $0xf0] sm:$0xff] }
 0x60d   :  { %v1447_v47 = vmul.f32 0.5, %v1443_v12  ;;  %v1449_v50 = vmul.f32 0.5, %v1445_v53  ;;  %v1706_v12 = vld [vmem:[#allocation2 + $0xf8] sm:$0xff] }
 0x60e   :  { %v1448_v35 = vmul.f32 0.5, %v1444_v40 }
 0x60f   :  { %2526 = vtanh.f32 %v1447_v47 }
 0x610   :  { %2528 = vtanh.f32 %v1448_v35 }
 0x611   :  { %2530 = vtanh.f32 %v1446_v49 }
 0x612   :  { %2532 = vtanh.f32 %v1449_v50 }
 0x619   :  { %v2527_v61 = vpop.eup %2526 }
 0x61a   :  { %v1453_v55 = vmul.f32 0.5, %v2527_v61  ;;  %v2529_v1 = vpop.eup %2528 }
 0x61b   :  { %v1454_v6 = vmul.f32 0.5, %v2529_v1  ;;  %v2531_v4 = vpop.eup %2530 }
 0x61c   :  { %v1456_v2 = vadd.f32 0.5, %v1453_v55  ;;  %v2533_v33 = vpop.eup %2532 }
 0x61d   :  { %v1457_v11 = vadd.f32 0.5, %v1454_v6  ;;  %v1455_v37 = vmul.f32 0.5, %v2533_v33 }
 0x61e   :  { %v1461_v21 = vmul.f32 %v2531_v4, %v1456_v2 }
 0x61f   :  { %v1460_v23 = vmul.f32 %v1457_v11, %v3080_v8  ;;  %v1458_v26 = vadd.f32 0.5, %v1455_v37  ;;  %v1704_v8 = vld [vmem:[#allocation2 + $0xe8] sm:$0xff] }
 0x621   :  { %v3118_v24 = vadd.f32 %v1461_v21, %v1460_v23 }
 0x623   :  { %2534 = vtanh.f32 %v3118_v24 }
 0x62d   :  { %v2535_v32 = vpop.eup %2534 }
 0x62e   :  { %v1464_v39 = vmul.f32 %v2535_v32, %v1458_v26 }
 0x630   :  { %1466 = vst [vmem:[#allocation8 + $0x28] sm:$0xff] %v1464_v39  ;;  %1601 = vmatmul.mubr.f32.vlgmr.msra.gmra.mrb[12].mxu0 %v1464_v39  ;;  %1672 = vmatmul.mubr.f32.vlgmr.msra.gmra.mrb[12].mxu1 %v1464_v39 }
 0x631   :  { %2406 = vmatpush1.bf16.msra.mxu0 %v2947_v56  ;;  %2438 = vmatpush1.bf16.msra.mxu1 %v2950_v62  ;;  %v1469_v56 = vld [vmem:[#allocation2 + $0xc8] sm:$0xff] }
 0x632   :  { %2408 = vmatprep.subr.bf16.mxu0 %v2955_v5  ;;  %2440 = vmatprep.subr.bf16.mxu1 %v2957_v17 }
 0x633   :  { %1835 = vmatprep.mubr.f32.mxu0 %v2655_v0  ;;  %1906 = vmatprep.mubr.f32.mxu1 %v2655_v0  ;;  %v1468_v0 = vld [vmem:[#allocation2 + $0xc0] sm:$0xff] }
 0x635   :  { %2410 = vmatpush1.bf16.msra.mxu0 %v2959_v13  ;;  %2442 = vmatpush1.bf16.msra.mxu1 %v2962_v20 }
 0x636   :  { %2412 = vmatprep.subr.bf16.mxu0 %v2967_v28  ;;  %2444 = vmatprep.subr.bf16.mxu1 %v2969_v38  ;;  %v1471_v38 = vld [vmem:[#allocation2 + $0xd8] sm:$0xff] }
 0x639   :  { %2414 = vmatpush1.bf16.msra.mxu0 %v2971_v43  ;;  %2446 = vmatpush1.bf16.msra.mxu1 %v2974_v16 }
 0x63a   :  { %2416 = vmatprep.subr.bf16.mxu0 %v2979_v30  ;;  %2448 = vmatprep.subr.bf16.mxu1 %v2981_v44  ;;  %v1470_v44 = vld [vmem:[#allocation2 + $0xd0] sm:$0xff] }
 0x63d   :  { %2418 = vmatpush1.bf16.msra.mxu0 %v2983_v46  ;;  %2450 = vmatpush1.bf16.msra.mxu1 %v2986_v57 }
 0x63e   :  { %2420 = vmatprep.subr.bf16.mxu0 %v2991_v7  ;;  %2452 = vmatprep.subr.bf16.mxu1 %v2993_v25 }
 0x641   :  { %2422 = vmatpush1.bf16.msra.mxu0 %v2995_v27  ;;  %2454 = vmatpush1.bf16.msra.mxu1 %v2998_v41 }
 0x642   :  { %2424 = vmatprep.subr.bf16.mxu0 %v3003_v45  ;;  %2456 = vmatprep.subr.bf16.mxu1 %v3005_v54 }
 0x645   :  { %2426 = vmatpush1.bf16.msra.mxu0 %v3007_v59  ;;  %2458 = vmatpush1.bf16.msra.mxu1 %v3010_v3 }
 0x646   :  { %2428 = vmatprep.subr.bf16.mxu0 %v3014_v14  ;;  %2460 = vmatprep.subr.bf16.mxu1 %v3016_v19 }
 0x649   :  { %2430 = vmatpush1.bf16.msra.mxu0 %v3019_v31  ;;  %2462 = vmatpush1.bf16.msra.mxu1 %v3023_v9 }
 0x64a   :  { %2432 = vmatprep.subr.bf16.mxu0 %v3025_v18  ;;  %2464 = vmatprep.subr.bf16.mxu1 %v3027_v36 }
 0x64d   :  { %2434 = vmatpush1.bf16.msra.mxu0 %v3030_v58  ;;  %2466 = vmatpush1.bf16.msra.mxu1 %v3034_v60  ;;  %v1703_v60 = vld [vmem:[#allocation2 + $0xe0] sm:$0xff] }
 0x703   :  { %v1602_v62 = vpop.f32.mrb[12].mxu0  ;;  %v1673_v5 = vpop.f32.mrb[12].mxu1 }
 0x704   :  { %v1678_v17 = vadd.f32 %v1602_v62, %v1468_v0  ;;  %v1604_v13 = vpop.f32.mrb[13].mxu0  ;;  %v1675_v20 = vpop.f32.mrb[13].mxu1  ;;  %v1680_v46 = vadd.f32 %v1673_v5, %v1470_v44 }
 0x705   :  { %v1679_v28 = vadd.f32 %v1604_v13, %v1469_v56  ;;  %v1681_v30 = vadd.f32 %v1675_v20, %v1471_v38 }
 0x706   :  { %v1682_v43 = vmul.f32 0.5, %v1678_v17  ;;  %v1684_v57 = vmul.f32 0.5, %v1680_v46 }
 0x707   :  { %v1683_v16 = vmul.f32 0.5, %v1679_v28 }
 0x708   :  { %2536 = vtanh.f32 %v1682_v43 }
 0x709   :  { %2538 = vtanh.f32 %v1683_v16 }
 0x70a   :  { %2540 = vtanh.f32 %v1681_v30 }
 0x70b   :  { %2542 = vtanh.f32 %v1684_v57 }
 0x712   :  { %v2537_v7 = vpop.eup %2536 }
 0x713   :  { %v1688_v25 = vmul.f32 0.5, %v2537_v7  ;;  %v2539_v27 = vpop.eup %2538 }
 0x714   :  { %v1689_v45 = vmul.f32 0.5, %v2539_v27  ;;  %v2541_v54 = vpop.eup %2540 }
 0x715   :  { %v1691_v41 = vadd.f32 0.5, %v1688_v25  ;;  %v2543_v31 = vpop.eup %2542 }
 0x716   :  { %v1692_v59 = vadd.f32 0.5, %v1689_v45  ;;  %v1690_v9 = vmul.f32 0.5, %v2543_v31 }
 0x717   :  { %v1696_v3 = vmul.f32 %v2541_v54, %v1691_v41 }
 0x718   :  { %v1695_v14 = vmul.f32 %v1692_v59, %v3118_v24  ;;  %v1693_v18 = vadd.f32 0.5, %v1690_v9 }
 0x71a   :  { %v1697_v19 = vadd.f32 %v1696_v3, %v1695_v14 }
 0x71c   :  { %2544 = vtanh.f32 %v1697_v19 }
 0x726   :  { %v2545_v36 = vpop.eup %2544 }
 0x727   :  { %v1699_v58 = vmul.f32 %v2545_v36, %v1693_v18 }
 0x729   :  { %1701 = vst [vmem:[#allocation8 + $0x30] sm:$0xff] %v1699_v58  ;;  %1836 = vmatmul.mubr.f32.vlgmr.msra.gmra.mrb[14].mxu0 %v1699_v58  ;;  %1907 = vmatmul.mubr.f32.vlgmr.msra.gmra.mrb[14].mxu1 %v1699_v58 }
 0x7fc   :  { %v1837_v48 = vpop.f32.mrb[14].mxu0  ;;  %v1908_v51 = vpop.f32.mrb[14].mxu1 }
 0x7fd   :  { %v1913_v22 = vadd.f32 %v1837_v48, %v1703_v60  ;;  %v1839_v29 = vpop.f32.mrb[15].mxu0  ;;  %v1910_v63 = vpop.f32.mrb[15].mxu1  ;;  %v1915_v47 = vadd.f32 %v1908_v51, %v1705_v42 }
 0x7fe   :  { %v1914_v10 = vadd.f32 %v1839_v29, %v1704_v8  ;;  %v1916_v40 = vadd.f32 %v1910_v63, %v1706_v12 }
 0x7ff   :  { %v1917_v15 = vmul.f32 0.5, %v1913_v22  ;;  %v1919_v35 = vmul.f32 0.5, %v1915_v47 }
 0x800   :  { %v1918_v34 = vmul.f32 0.5, %v1914_v10 }
 0x801   :  { %2546 = vtanh.f32 %v1917_v15 }
 0x802   :  { %2548 = vtanh.f32 %v1918_v34 }
 0x803   :  { %2550 = vtanh.f32 %v1916_v40 }
 0x804   :  { %2552 = vtanh.f32 %v1919_v35 }
 0x80b   :  { %v2547_v49 = vpop.eup %2546 }
 0x80c   :  { %v1923_v52 = vmul.f32 0.5, %v2547_v49  ;;  %v2549_v53 = vpop.eup %2548 }
 0x80d   :  { %v1924_v61 = vmul.f32 0.5, %v2549_v53  ;;  %v2551_v55 = vpop.eup %2550 }
 0x80e   :  { %v1926_v50 = vadd.f32 0.5, %v1923_v52  ;;  %v2553_v11 = vpop.eup %2552 }
 0x80f   :  { %v1927_v1 = vadd.f32 0.5, %v1924_v61  ;;  %v1925_v21 = vmul.f32 0.5, %v2553_v11 }
 0x810   :  { %v1931_v2 = vmul.f32 %v2551_v55, %v1926_v50 }
 0x811   :  { %v1930_v6 = vmul.f32 %v1927_v1, %v1697_v19  ;;  %v1928_v23 = vadd.f32 0.5, %v1925_v21 }
 0x813   :  { %v1932_v4 = vadd.f32 %v1931_v2, %v1930_v6 }
 0x815   :  { %2554 = vtanh.f32 %v1932_v4 }
 0x81f   :  { %v2555_v24 = vpop.eup %2554 }
 0x820   :  { %v1934_v33 = vmul.f32 %v2555_v24, %v1928_v23 }
 0x822   :  { %1936 = vst [vmem:[#allocation8 + $0x38] sm:$0xff] %v1934_v33 }
 0x823   :  { %2633 = shalt.err (!%p2630_p0)
}
 0x824   :  { %s2634_s30 = scalar_lea.hbm %s3170_s4, 1024 }
 0x825   :  { %p2635_p1 = scmp.ne.s32.totalorder %s3170_s4, %s2634_s30  ;;  %p2638_p2 = scmp.lt.u32.totalorder %s2634_s30, %s3170_s4 }
 0x827   :  { %p2640_p3 = pnand %p2638_p2, %p2635_p1 }
 0x829   :  { %2643 = shalt.err (!%p2640_p3)
}
 0x82a   :  { %s2657_s9 = smov 128   ;;  %s2658_s10 = smov 8  }
 0x82b   :  { %1948 = dma.vmem_to_hbm [thread:$0]  %s1943_s26, 1024, %s3170_s4, [#allocation4], %s2657_s9, %s2657_s9, %s2658_s10  }
 0x82c   :  { %2648 = dma.done.wait [#allocation4], 1024  }
 0x82d   :  { %2649 = vsyncadd [#allocation4], 4294966272 }
 0x82e   :  { %1952 = vsyncpa [#allocation3], 1 }
 0x82f   :  { %1953 = vsyncpa [#allocation6], 1 }
 0x830   :  { %1954 = vsyncpa [#allocation4], 1 }

</bundles_post_ra>
